<compile_context>
chip_gen: v5e
topology: v5e:2x2
jax: 0.10.0
libtpu: 0.0.40
codegen_flags: <defaults>
</compile_context>

<pallas_src>
import jax
import jax.numpy as jnp
from jax import lax
from jax.experimental import pallas as pl
from jax.experimental.pallas import tpu as pltpu

_SUBLANE = 8  # f32 sublane tile


# ----------------------------------------------------------------------------
# Fused kernel: all LSTM layers + decoder, single invocation (grid=(1,)).
# Gate order follows PyTorch: i, f, g, o (chunks of size H along the 4H axis).
# g-gate columns arrive pre-scaled by 2 so tanh(z) = 2*sigmoid(2z) - 1.
# ----------------------------------------------------------------------------
def _make_posenet_kernel(num_layers, T, Bp, H):
    def kernel(*args):
        x_ref = args[0]                                   # (T*Bp, D_in)
        layer_refs = args[1:1 + 3 * num_layers]           # (wih_t, whh_t, b)*L
        wdec_ref = args[1 + 3 * num_layers]               # (H, 2)
        bdec_ref = args[2 + 3 * num_layers]               # (1, 2)
        out_ref = args[3 + 3 * num_layers]                # (Bp, 2)
        g_sc = args[4 + 3 * num_layers]                   # VMEM (T*Bp, 4H)

        wih0_ref, _, b0_ref = layer_refs[0], layer_refs[1], layer_refs[2]

        # Hoisted layer-0 input projection for ALL timesteps at once:
        #   (T*Bp, D_in) @ (D_in, 4H) + bias  -> (T*Bp, 4H)
        g_sc[...] = (jnp.dot(x_ref[...], wih0_ref[...],
                             preferred_element_type=jnp.float32)
                     + b0_ref[...])

        # Lane mask for the g-gate lanes.  Hoisted out of all loops
        # (JAX does not CSE broadcast_in_dim).
        lane = lax.broadcasted_iota(jnp.int32, (Bp, 4 * H), 1)
        g_mask = (lane >= 2 * H) & (lane < 3 * H)

        # Load weights once as values (they stay resident in vregs/VMEM).
        whh = [layer_refs[3 * l + 1][...] for l in range(num_layers)]
        wih = [None] + [layer_refs[3 * l + 0][...]
                        for l in range(1, num_layers)]
        bias = [None] + [layer_refs[3 * l + 2][...]
                         for l in range(1, num_layers)]

        def lstm_step(gates, c_prev, t):
            # One full-vreg sigmoid on the EUP; g-gate via 2*sigmoid(2z)-1.
            sig = jax.nn.sigmoid(gates)
            act = jnp.where(g_mask, 2.0 * sig - 1.0, sig)   # (Bp, 4H)
            i_g = act[:, 0 * H:1 * H]
            f_g = act[:, 1 * H:2 * H]
            g_g = act[:, 2 * H:3 * H]
            o_g = act[:, 3 * H:4 * H]
            if t == 0:                                      # peeled: c_prev = 0
                c_new = i_g * g_g
            else:
                c_new = f_g * c_prev + i_g * g_g
            h_new = o_g * jnp.tanh(c_new)
            return h_new, c_new

        # Wavefront over the layer stack: at wavefront step s, layer l runs
        # timestep t = s - l.  Serial chain length = T + L - 1 (not T * L).
        # All updates within a step read the PREVIOUS step's state and are
        # committed together afterwards.
        h = [None] * num_layers
        c = [None] * num_layers
        for s in range(T + num_layers - 1):
            updates = []
            for l in range(num_layers):
                t = s - l
                if not (0 <= t < T):
                    continue
                if l == 0:
                    pre = g_sc[t * Bp:(t + 1) * Bp, :]      # static slice
                    if t == 0:                               # peeled: h = 0
                        gates = pre
                    else:
                        gates = pre + jnp.dot(
                            h[0], whh[0], preferred_element_type=jnp.float32)
                else:
                    x_in = h[l - 1]          # h_{l-1, t}, committed last step
                    gates = (jnp.dot(x_in, wih[l],
                                     preferred_element_type=jnp.float32)
                             + bias[l])
                    if t > 0:                                # peeled: h = 0
                        gates = gates + jnp.dot(
                            h[l], whh[l], preferred_element_type=jnp.float32)
                updates.append((l,) + lstm_step(gates, c[l], t))
            for l, h_new, c_new in updates:
                h[l] = h_new
                c[l] = c_new

        # Decoder fused in: res = h_T @ W_dec^T + b_dec   -> (Bp, 2)
        out_ref[...] = (jnp.dot(h[num_layers - 1], wdec_ref[...],
                                preferred_element_type=jnp.float32)
                        + bdec_ref[...])

    return kernel


def _posenet_pallas(x_2d, layer_params, w_dec_t, b_dec, *, T, Bp, H):
    num_layers = len(layer_params)
    D_in = x_2d.shape[-1]
    O = w_dec_t.shape[-1]

    kernel = _make_posenet_kernel(num_layers, T, Bp, H)

    in_specs = [pl.BlockSpec((T * Bp, D_in), lambda i: (0, 0))]
    inputs = [x_2d]
    for (wih_t, whh_t, bias) in layer_params:
        in_specs += [
            pl.BlockSpec(wih_t.shape, lambda i: (0, 0)),
            pl.BlockSpec(whh_t.shape, lambda i: (0, 0)),
            pl.BlockSpec(bias.shape, lambda i: (0, 0)),
        ]
        inputs += [wih_t, whh_t, bias]
    in_specs += [
        pl.BlockSpec(w_dec_t.shape, lambda i: (0, 0)),
        pl.BlockSpec(b_dec.shape, lambda i: (0, 0)),
    ]
    inputs += [w_dec_t, b_dec]

    return pl.pallas_call(
        kernel,
        out_shape=jax.ShapeDtypeStruct((Bp, O), jnp.float32),
        grid_spec=pltpu.PrefetchScalarGridSpec(
            num_scalar_prefetch=0,
            grid=(1,),
            in_specs=in_specs,
            out_specs=pl.BlockSpec((Bp, O), lambda i: (0, 0)),
            scratch_shapes=[
                pltpu.VMEM((T * Bp, 4 * H), jnp.float32),  # hoisted gate proj
            ],
        ),
        compiler_params=pltpu.CompilerParams(
            dimension_semantics=("arbitrary",)),
    )(*inputs)


# ----------------------------------------------------------------------------
# Parameter init (PyTorch layout, for the reference) + one-time prep for the
# kernel (pre-transposed weights, pre-combined biases, g-gate columns x2).
# ----------------------------------------------------------------------------
def init_posenet_params(key, num_hiddens, num_layers, input_size=34):
    params = {"layers": []}
    scale = 1.0 / jnp.sqrt(jnp.float32(num_hiddens))
    for layer in range(num_layers):
        d_in = input_size if layer == 0 else num_hiddens
        key, k1, k2, k3, k4 = jax.random.split(key, 5)
        w_ih = jax.random.uniform(k1, (4 * num_hiddens, d_in),
                                  jnp.float32, -scale, scale)
        w_hh = jax.random.uniform(k2, (4 * num_hiddens, num_hiddens),
                                  jnp.float32, -scale, scale)
        b_ih = jax.random.uniform(k3, (4 * num_hiddens,),
                                  jnp.float32, -scale, scale)
        b_hh = jax.random.uniform(k4, (4 * num_hiddens,),
                                  jnp.float32, -scale, scale)
        params["layers"].append((w_ih, w_hh, b_ih, b_hh))
    key, k5, k6 = jax.random.split(key, 3)
    params["w_dec"] = jax.random.uniform(k5, (2, num_hiddens),
                                         jnp.float32, -scale, scale)
    params["b_dec"] = jax.random.uniform(k6, (2,), jnp.float32, -scale, scale)
    return params


def prepare_pallas_params(params):
    """Done ONCE: transpose weights, combine biases, pre-scale g-gate cols by
    2 so the kernel can use tanh(z) = 2*sigmoid(2z) - 1 (one EUP op/step)."""
    layers = []
    for (w_ih, w_hh, b_ih, b_hh) in params["layers"]:
        H = w_hh.shape[1]
        col_scale = jnp.ones((1, 4 * H), jnp.float32)
        col_scale = col_scale.at[:, 2 * H:3 * H].set(2.0)
        layers.append((jnp.transpose(w_ih) * col_scale,          # (D_in, 4H)
                       jnp.transpose(w_hh) * col_scale,          # (H, 4H)
                       (b_ih + b_hh).reshape(1, -1) * col_scale))  # (1, 4H)
    return {
        "layers": layers,
        "w_dec_t": jnp.transpose(params["w_dec"]),               # (H, 2)
        "b_dec": params["b_dec"].reshape(1, -1),                 # (1, 2)
    }


@jax.jit
def posenet_forward(x, prepared):
    """x: (T, B, 34) float32 -> (B, 2) float32."""
    T, B, D_in = x.shape
    H = prepared["layers"][0][1].shape[0]
    Bp = max(_SUBLANE, ((B + _SUBLANE - 1) // _SUBLANE) * _SUBLANE)
    if Bp != B:
        # Pad batch to a full sublane tile once, up front.
        # TODO(synk): for multi-window throughput, pack independent sequences
        # into Bp (up to MXU height) and, on v7x, add a "parallel" grid axis
        # over windows so the second TensorCore isn't idle.
        x = jnp.pad(x, ((0, 0), (0, Bp - B), (0, 0)))
    x_2d = x.reshape(T * Bp, D_in)
    out = _posenet_pallas(x_2d, prepared["layers"], prepared["w_dec_t"],
                          prepared["b_dec"], T=T, Bp=Bp, H=H)
    return out[:B]


# ----------------------------------------------------------------------------
# Pure-JAX reference (mirrors PyTorch nn.LSTM + nn.Linear semantics)
# ----------------------------------------------------------------------------
def posenet_reference(x, params):
    T, B, _ = x.shape
    y = x
    h_last = None
    for (w_ih, w_hh, b_ih, b_hh) in params["layers"]:
        H = w_hh.shape[1]
        h = jnp.zeros((B, H), jnp.float32)
        c = jnp.zeros((B, H), jnp.float32)
        outs = []
        for t in range(T):
            gates = y[t] @ w_ih.T + h @ w_hh.T + b_ih + b_hh
            i_g = jax.nn.sigmoid(gates[:, 0 * H:1 * H])
            f_g = jax.nn.sigmoid(gates[:, 1 * H:2 * H])
            g_g = jnp.tanh(gates[:, 2 * H:3 * H])
            o_g = jax.nn.sigmoid(gates[:, 3 * H:4 * H])
            c = f_g * c + i_g * g_g
            h = o_g * jnp.tanh(c)
            outs.append(h)
        y = jnp.stack(outs, axis=0)
        h_last = h
    return h_last @ params["w_dec"].T + params["b_dec"]


if __name__ == "__main__":
    window_size = 8       # T
    batch = 2             # B
    num_hiddens = 32      # H
    num_layers = 2
    input_size = 17 * 2   # 34

    key = jax.random.PRNGKey(0)
    k_x, k_p = jax.random.split(key)
    x = jax.random.normal(k_x, (window_size, batch, input_size), jnp.float32)
    params = init_posenet_params(k_p, num_hiddens, num_layers, input_size)
    prepared = prepare_pallas_params(params)

    out = posenet_forward(x, prepared)
    out = jax.block_until_ready(out)

    ref = posenet_reference(x, params)
    assert out.shape == (batch, 2), out.shape
    assert jnp.allclose(out, ref, atol=1e-4, rtol=1e-4), (out, ref)

    print("KERNEL_OK")
</pallas_src>

<mosaic_0001>
module attributes {stable_mosaic.version = 11 : i64} {
  func.func @kernel(%arg0: i32, %arg1: memref<64x34xf32, #tpu.memory_space<vmem>>, %arg2: memref<34x128xf32, #tpu.memory_space<vmem>>, %arg3: memref<32x128xf32, #tpu.memory_space<vmem>>, %arg4: memref<1x128xf32, #tpu.memory_space<vmem>>, %arg5: memref<32x128xf32, #tpu.memory_space<vmem>>, %arg6: memref<32x128xf32, #tpu.memory_space<vmem>>, %arg7: memref<1x128xf32, #tpu.memory_space<vmem>>, %arg8: memref<32x2xf32, #tpu.memory_space<vmem>>, %arg9: memref<1x2xf32, #tpu.memory_space<vmem>>, %arg10: memref<8x2xf32, #tpu.memory_space<vmem>>, %arg11: memref<64x128xf32, #tpu.memory_space<vmem>>) attributes {dimension_semantics = [#tpu.dimension_semantics<arbitrary>], iteration_bounds = array<i64: 1>, scalar_prefetch = 0 : i64, scratch_operands = 1 : i64, tpu.core_type = #tpu.core_type<tc>, window_params = [{pipeline_mode = #tpu.pipeline_mode<synchronous>, transform_indices = @transform_0, window_bounds = array<i64: 64, 34>}, {pipeline_mode = #tpu.pipeline_mode<synchronous>, transform_indices = @transform_1, window_bounds = array<i64: 34, 128>}, {pipeline_mode = #tpu.pipeline_mode<synchronous>, transform_indices = @transform_2, window_bounds = array<i64: 32, 128>}, {pipeline_mode = #tpu.pipeline_mode<synchronous>, transform_indices = @transform_3, window_bounds = array<i64: 1, 128>}, {pipeline_mode = #tpu.pipeline_mode<synchronous>, transform_indices = @transform_4, window_bounds = array<i64: 32, 128>}, {pipeline_mode = #tpu.pipeline_mode<synchronous>, transform_indices = @transform_5, window_bounds = array<i64: 32, 128>}, {pipeline_mode = #tpu.pipeline_mode<synchronous>, transform_indices = @transform_6, window_bounds = array<i64: 1, 128>}, {pipeline_mode = #tpu.pipeline_mode<synchronous>, transform_indices = @transform_7, window_bounds = array<i64: 32, 2>}, {pipeline_mode = #tpu.pipeline_mode<synchronous>, transform_indices = @transform_8, window_bounds = array<i64: 1, 2>}, {pipeline_mode = #tpu.pipeline_mode<synchronous>, transform_indices = @transform_9, window_bounds = array<i64: 8, 2>}]} {
    %c0 = arith.constant 0 : index
    %c0_0 = arith.constant 0 : index
    %0 = vector.load %arg1[%c0, %c0_0] : memref<64x34xf32, #tpu.memory_space<vmem>>, vector<64x34xf32>
    %c0_1 = arith.constant 0 : index
    %c0_2 = arith.constant 0 : index
    %1 = vector.load %arg2[%c0_1, %c0_2] : memref<34x128xf32, #tpu.memory_space<vmem>>, vector<34x128xf32>
    %cst = arith.constant dense<0.000000e+00> : vector<64x128xf32>
    %2 = tpu.matmul %0, %1, %cst {dimension_numbers = #tpu.dot_dimension_numbers<[1], [0], [0], [1], [0, 0, 1, 1], [], []>} : vector<64x34xf32>, vector<34x128xf32>, vector<64x128xf32> -> vector<64x128xf32>
    %c0_3 = arith.constant 0 : index
    %c0_4 = arith.constant 0 : index
    %3 = vector.load %arg4[%c0_3, %c0_4] : memref<1x128xf32, #tpu.memory_space<vmem>>, vector<1x128xf32>
    %4 = vector.broadcast %3 : vector<1x128xf32> to vector<64x128xf32>
    %5 = arith.addf %2, %4 : vector<64x128xf32>
    %c0_5 = arith.constant 0 : index
    %c0_6 = arith.constant 0 : index
    %6 = vector.load %arg11[%c0_5, %c0_6] : memref<64x128xf32, #tpu.memory_space<vmem>>, vector<64x128xf32>
    tpu.vector_store %arg11[%c0_5, %c0_6], %5 {strides = array<i32>} : memref<64x128xf32, #tpu.memory_space<vmem>>, vector<64x128xf32>,
    %7 = tpu.iota {dimensions = array<i32: 1>} : vector<8x128xi32>
    %c64_i32 = arith.constant 64 : i32
    %8 = vector.broadcast %c64_i32 : i32 to vector<8x128xi32>
    %9 = arith.cmpi sge, %7, %8 : vector<8x128xi32>
    %c96_i32 = arith.constant 96 : i32
    %10 = vector.broadcast %c96_i32 : i32 to vector<8x128xi32>
    %11 = arith.cmpi slt, %7, %10 : vector<8x128xi32>
    %12 = arith.andi %9, %11 : vector<8x128xi1>
    %c0_7 = arith.constant 0 : index
    %c0_8 = arith.constant 0 : index
    %13 = vector.load %arg3[%c0_7, %c0_8] : memref<32x128xf32, #tpu.memory_space<vmem>>, vector<32x128xf32>
    %c0_9 = arith.constant 0 : index
    %c0_10 = arith.constant 0 : index
    %14 = vector.load %arg6[%c0_9, %c0_10] : memref<32x128xf32, #tpu.memory_space<vmem>>, vector<32x128xf32>
    %c0_11 = arith.constant 0 : index
    %c0_12 = arith.constant 0 : index
    %15 = vector.load %arg5[%c0_11, %c0_12] : memref<32x128xf32, #tpu.memory_space<vmem>>, vector<32x128xf32>
    %c0_13 = arith.constant 0 : index
    %c0_14 = arith.constant 0 : index
    %16 = vector.load %arg7[%c0_13, %c0_14] : memref<1x128xf32, #tpu.memory_space<vmem>>, vector<1x128xf32>
    %c0_15 = arith.constant 0 : index
    %c0_16 = arith.constant 0 : index
    %17 = vector.load %arg11[%c0_15, %c0_16] : memref<64x128xf32, #tpu.memory_space<vmem>>, vector<8x128xf32>
    %18 = arith.negf %17 : vector<8x128xf32>
    %19 = math.exp %18 : vector<8x128xf32>
    %cst_17 = arith.constant 1.000000e+00 : f32
    %20 = vector.broadcast %cst_17 : f32 to vector<8x128xf32>
    %21 = arith.addf %20, %19 : vector<8x128xf32>
    %22 = arith.divf %20, %21 : vector<8x128xf32>
    %cst_18 = arith.constant 2.000000e+00 : f32
    %23 = vector.broadcast %cst_18 : f32 to vector<8x128xf32>
    %24 = arith.mulf %23, %22 : vector<8x128xf32>
    %cst_19 = arith.constant 1.000000e+00 : f32
    %25 = vector.broadcast %cst_19 : f32 to vector<8x128xf32>
    %26 = arith.subf %24, %25 : vector<8x128xf32>
    %27 = arith.select %12, %26, %22 : vector<8x128xi1>, vector<8x128xf32>
    %28 = vector.extract_strided_slice %27 {offsets = [0, 0], sizes = [8, 32], strides = [1, 1]} : vector<8x128xf32> to vector<8x32xf32>
    %29 = vector.extract_strided_slice %27 {offsets = [0, 64], sizes = [8, 32], strides = [1, 1]} : vector<8x128xf32> to vector<8x32xf32>
    %30 = vector.extract_strided_slice %27 {offsets = [0, 96], sizes = [8, 32], strides = [1, 1]} : vector<8x128xf32> to vector<8x32xf32>
    %31 = arith.mulf %28, %29 : vector<8x32xf32>
    %32 = math.tanh %31 : vector<8x32xf32>
    %33 = arith.mulf %30, %32 : vector<8x32xf32>
    %c8 = arith.constant 8 : index
    %c0_20 = arith.constant 0 : index
    %34 = vector.load %arg11[%c8, %c0_20] : memref<64x128xf32, #tpu.memory_space<vmem>>, vector<8x128xf32>
    %cst_21 = arith.constant dense<0.000000e+00> : vector<8x128xf32>
    %35 = tpu.matmul %33, %13, %cst_21 {dimension_numbers = #tpu.dot_dimension_numbers<[1], [0], [0], [1], [0, 0, 1, 1], [], []>} : vector<8x32xf32>, vector<32x128xf32>, vector<8x128xf32> -> vector<8x128xf32>
    %36 = arith.addf %34, %35 : vector<8x128xf32>
    %37 = arith.negf %36 : vector<8x128xf32>
    %38 = math.exp %37 : vector<8x128xf32>
    %cst_22 = arith.constant 1.000000e+00 : f32
    %39 = vector.broadcast %cst_22 : f32 to vector<8x128xf32>
    %40 = arith.addf %39, %38 : vector<8x128xf32>
    %41 = arith.divf %39, %40 : vector<8x128xf32>
    %cst_23 = arith.constant 2.000000e+00 : f32
    %42 = vector.broadcast %cst_23 : f32 to vector<8x128xf32>
    %43 = arith.mulf %42, %41 : vector<8x128xf32>
    %cst_24 = arith.constant 1.000000e+00 : f32
    %44 = vector.broadcast %cst_24 : f32 to vector<8x128xf32>
    %45 = arith.subf %43, %44 : vector<8x128xf32>
    %46 = arith.select %12, %45, %41 : vector<8x128xi1>, vector<8x128xf32>
    %47 = vector.extract_strided_slice %46 {offsets = [0, 0], sizes = [8, 32], strides = [1, 1]} : vector<8x128xf32> to vector<8x32xf32>
    %48 = vector.extract_strided_slice %46 {offsets = [0, 32], sizes = [8, 32], strides = [1, 1]} : vector<8x128xf32> to vector<8x32xf32>
    %49 = vector.extract_strided_slice %46 {offsets = [0, 64], sizes = [8, 32], strides = [1, 1]} : vector<8x128xf32> to vector<8x32xf32>
    %50 = vector.extract_strided_slice %46 {offsets = [0, 96], sizes = [8, 32], strides = [1, 1]} : vector<8x128xf32> to vector<8x32xf32>
    %51 = arith.mulf %48, %31 : vector<8x32xf32>
    %52 = arith.mulf %47, %49 : vector<8x32xf32>
    %53 = arith.addf %51, %52 : vector<8x32xf32>
    %54 = math.tanh %53 : vector<8x32xf32>
    %55 = arith.mulf %50, %54 : vector<8x32xf32>
    %cst_25 = arith.constant dense<0.000000e+00> : vector<8x128xf32>
    %56 = tpu.matmul %33, %15, %cst_25 {dimension_numbers = #tpu.dot_dimension_numbers<[1], [0], [0], [1], [0, 0, 1, 1], [], []>} : vector<8x32xf32>, vector<32x128xf32>, vector<8x128xf32> -> vector<8x128xf32>
    %57 = vector.broadcast %16 : vector<1x128xf32> to vector<8x128xf32>
    %58 = arith.addf %56, %57 : vector<8x128xf32>
    %59 = arith.negf %58 : vector<8x128xf32>
    %60 = math.exp %59 : vector<8x128xf32>
    %cst_26 = arith.constant 1.000000e+00 : f32
    %61 = vector.broadcast %cst_26 : f32 to vector<8x128xf32>
    %62 = arith.addf %61, %60 : vector<8x128xf32>
    %63 = arith.divf %61, %62 : vector<8x128xf32>
    %cst_27 = arith.constant 2.000000e+00 : f32
    %64 = vector.broadcast %cst_27 : f32 to vector<8x128xf32>
    %65 = arith.mulf %64, %63 : vector<8x128xf32>
    %cst_28 = arith.constant 1.000000e+00 : f32
    %66 = vector.broadcast %cst_28 : f32 to vector<8x128xf32>
    %67 = arith.subf %65, %66 : vector<8x128xf32>
    %68 = arith.select %12, %67, %63 : vector<8x128xi1>, vector<8x128xf32>
    %69 = vector.extract_strided_slice %68 {offsets = [0, 0], sizes = [8, 32], strides = [1, 1]} : vector<8x128xf32> to vector<8x32xf32>
    %70 = vector.extract_strided_slice %68 {offsets = [0, 64], sizes = [8, 32], strides = [1, 1]} : vector<8x128xf32> to vector<8x32xf32>
    %71 = vector.extract_strided_slice %68 {offsets = [0, 96], sizes = [8, 32], strides = [1, 1]} : vector<8x128xf32> to vector<8x32xf32>
    %72 = arith.mulf %69, %70 : vector<8x32xf32>
    %73 = math.tanh %72 : vector<8x32xf32>
    %74 = arith.mulf %71, %73 : vector<8x32xf32>
    %c16 = arith.constant 16 : index
    %c0_29 = arith.constant 0 : index
    %75 = vector.load %arg11[%c16, %c0_29] : memref<64x128xf32, #tpu.memory_space<vmem>>, vector<8x128xf32>
    %cst_30 = arith.constant dense<0.000000e+00> : vector<8x128xf32>
    %76 = tpu.matmul %55, %13, %cst_30 {dimension_numbers = #tpu.dot_dimension_numbers<[1], [0], [0], [1], [0, 0, 1, 1], [], []>} : vector<8x32xf32>, vector<32x128xf32>, vector<8x128xf32> -> vector<8x128xf32>
    %77 = arith.addf %75, %76 : vector<8x128xf32>
    %78 = arith.negf %77 : vector<8x128xf32>
    %79 = math.exp %78 : vector<8x128xf32>
    %cst_31 = arith.constant 1.000000e+00 : f32
    %80 = vector.broadcast %cst_31 : f32 to vector<8x128xf32>
    %81 = arith.addf %80, %79 : vector<8x128xf32>
    %82 = arith.divf %80, %81 : vector<8x128xf32>
    %cst_32 = arith.constant 2.000000e+00 : f32
    %83 = vector.broadcast %cst_32 : f32 to vector<8x128xf32>
    %84 = arith.mulf %83, %82 : vector<8x128xf32>
    %cst_33 = arith.constant 1.000000e+00 : f32
    %85 = vector.broadcast %cst_33 : f32 to vector<8x128xf32>
    %86 = arith.subf %84, %85 : vector<8x128xf32>
    %87 = arith.select %12, %86, %82 : vector<8x128xi1>, vector<8x128xf32>
    %88 = vector.extract_strided_slice %87 {offsets = [0, 0], sizes = [8, 32], strides = [1, 1]} : vector<8x128xf32> to vector<8x32xf32>
    %89 = vector.extract_strided_slice %87 {offsets = [0, 32], sizes = [8, 32], strides = [1, 1]} : vector<8x128xf32> to vector<8x32xf32>
    %90 = vector.extract_strided_slice %87 {offsets = [0, 64], sizes = [8, 32], strides = [1, 1]} : vector<8x128xf32> to vector<8x32xf32>
    %91 = vector.extract_strided_slice %87 {offsets = [0, 96], sizes = [8, 32], strides = [1, 1]} : vector<8x128xf32> to vector<8x32xf32>
    %92 = arith.mulf %89, %53 : vector<8x32xf32>
    %93 = arith.mulf %88, %90 : vector<8x32xf32>
    %94 = arith.addf %92, %93 : vector<8x32xf32>
    %95 = math.tanh %94 : vector<8x32xf32>
    %96 = arith.mulf %91, %95 : vector<8x32xf32>
    %cst_34 = arith.constant dense<0.000000e+00> : vector<8x128xf32>
    %97 = tpu.matmul %55, %15, %cst_34 {dimension_numbers = #tpu.dot_dimension_numbers<[1], [0], [0], [1], [0, 0, 1, 1], [], []>} : vector<8x32xf32>, vector<32x128xf32>, vector<8x128xf32> -> vector<8x128xf32>
    %98 = vector.broadcast %16 : vector<1x128xf32> to vector<8x128xf32>
    %99 = arith.addf %97, %98 : vector<8x128xf32>
    %cst_35 = arith.constant dense<0.000000e+00> : vector<8x128xf32>
    %100 = tpu.matmul %74, %14, %cst_35 {dimension_numbers = #tpu.dot_dimension_numbers<[1], [0], [0], [1], [0, 0, 1, 1], [], []>} : vector<8x32xf32>, vector<32x128xf32>, vector<8x128xf32> -> vector<8x128xf32>
    %101 = arith.addf %99, %100 : vector<8x128xf32>
    %102 = arith.negf %101 : vector<8x128xf32>
    %103 = math.exp %102 : vector<8x128xf32>
    %cst_36 = arith.constant 1.000000e+00 : f32
    %104 = vector.broadcast %cst_36 : f32 to vector<8x128xf32>
    %105 = arith.addf %104, %103 : vector<8x128xf32>
    %106 = arith.divf %104, %105 : vector<8x128xf32>
    %cst_37 = arith.constant 2.000000e+00 : f32
    %107 = vector.broadcast %cst_37 : f32 to vector<8x128xf32>
    %108 = arith.mulf %107, %106 : vector<8x128xf32>
    %cst_38 = arith.constant 1.000000e+00 : f32
    %109 = vector.broadcast %cst_38 : f32 to vector<8x128xf32>
    %110 = arith.subf %108, %109 : vector<8x128xf32>
    %111 = arith.select %12, %110, %106 : vector<8x128xi1>, vector<8x128xf32>
    %112 = vector.extract_strided_slice %111 {offsets = [0, 0], sizes = [8, 32], strides = [1, 1]} : vector<8x128xf32> to vector<8x32xf32>
    %113 = vector.extract_strided_slice %111 {offsets = [0, 32], sizes = [8, 32], strides = [1, 1]} : vector<8x128xf32> to vector<8x32xf32>
    %114 = vector.extract_strided_slice %111 {offsets = [0, 64], sizes = [8, 32], strides = [1, 1]} : vector<8x128xf32> to vector<8x32xf32>
    %115 = vector.extract_strided_slice %111 {offsets = [0, 96], sizes = [8, 32], strides = [1, 1]} : vector<8x128xf32> to vector<8x32xf32>
    %116 = arith.mulf %113, %72 : vector<8x32xf32>
    %117 = arith.mulf %112, %114 : vector<8x32xf32>
    %118 = arith.addf %116, %117 : vector<8x32xf32>
    %119 = math.tanh %118 : vector<8x32xf32>
    %120 = arith.mulf %115, %119 : vector<8x32xf32>
    %c24 = arith.constant 24 : index
    %c0_39 = arith.constant 0 : index
    %121 = vector.load %arg11[%c24, %c0_39] : memref<64x128xf32, #tpu.memory_space<vmem>>, vector<8x128xf32>
    %cst_40 = arith.constant dense<0.000000e+00> : vector<8x128xf32>
    %122 = tpu.matmul %96, %13, %cst_40 {dimension_numbers = #tpu.dot_dimension_numbers<[1], [0], [0], [1], [0, 0, 1, 1], [], []>} : vector<8x32xf32>, vector<32x128xf32>, vector<8x128xf32> -> vector<8x128xf32>
    %123 = arith.addf %121, %122 : vector<8x128xf32>
    %124 = arith.negf %123 : vector<8x128xf32>
    %125 = math.exp %124 : vector<8x128xf32>
    %cst_41 = arith.constant 1.000000e+00 : f32
    %126 = vector.broadcast %cst_41 : f32 to vector<8x128xf32>
    %127 = arith.addf %126, %125 : vector<8x128xf32>
    %128 = arith.divf %126, %127 : vector<8x128xf32>
    %cst_42 = arith.constant 2.000000e+00 : f32
    %129 = vector.broadcast %cst_42 : f32 to vector<8x128xf32>
    %130 = arith.mulf %129, %128 : vector<8x128xf32>
    %cst_43 = arith.constant 1.000000e+00 : f32
    %131 = vector.broadcast %cst_43 : f32 to vector<8x128xf32>
    %132 = arith.subf %130, %131 : vector<8x128xf32>
    %133 = arith.select %12, %132, %128 : vector<8x128xi1>, vector<8x128xf32>
    %134 = vector.extract_strided_slice %133 {offsets = [0, 0], sizes = [8, 32], strides = [1, 1]} : vector<8x128xf32> to vector<8x32xf32>
    %135 = vector.extract_strided_slice %133 {offsets = [0, 32], sizes = [8, 32], strides = [1, 1]} : vector<8x128xf32> to vector<8x32xf32>
    %136 = vector.extract_strided_slice %133 {offsets = [0, 64], sizes = [8, 32], strides = [1, 1]} : vector<8x128xf32> to vector<8x32xf32>
    %137 = vector.extract_strided_slice %133 {offsets = [0, 96], sizes = [8, 32], strides = [1, 1]} : vector<8x128xf32> to vector<8x32xf32>
    %138 = arith.mulf %135, %94 : vector<8x32xf32>
    %139 = arith.mulf %134, %136 : vector<8x32xf32>
    %140 = arith.addf %138, %139 : vector<8x32xf32>
    %141 = math.tanh %140 : vector<8x32xf32>
    %142 = arith.mulf %137, %141 : vector<8x32xf32>
    %cst_44 = arith.constant dense<0.000000e+00> : vector<8x128xf32>
    %143 = tpu.matmul %96, %15, %cst_44 {dimension_numbers = #tpu.dot_dimension_numbers<[1], [0], [0], [1], [0, 0, 1, 1], [], []>} : vector<8x32xf32>, vector<32x128xf32>, vector<8x128xf32> -> vector<8x128xf32>
    %144 = vector.broadcast %16 : vector<1x128xf32> to vector<8x128xf32>
    %145 = arith.addf %143, %144 : vector<8x128xf32>
    %cst_45 = arith.constant dense<0.000000e+00> : vector<8x128xf32>
    %146 = tpu.matmul %120, %14, %cst_45 {dimension_numbers = #tpu.dot_dimension_numbers<[1], [0], [0], [1], [0, 0, 1, 1], [], []>} : vector<8x32xf32>, vector<32x128xf32>, vector<8x128xf32> -> vector<8x128xf32>
    %147 = arith.addf %145, %146 : vector<8x128xf32>
    %148 = arith.negf %147 : vector<8x128xf32>
    %149 = math.exp %148 : vector<8x128xf32>
    %cst_46 = arith.constant 1.000000e+00 : f32
    %150 = vector.broadcast %cst_46 : f32 to vector<8x128xf32>
    %151 = arith.addf %150, %149 : vector<8x128xf32>
    %152 = arith.divf %150, %151 : vector<8x128xf32>
    %cst_47 = arith.constant 2.000000e+00 : f32
    %153 = vector.broadcast %cst_47 : f32 to vector<8x128xf32>
    %154 = arith.mulf %153, %152 : vector<8x128xf32>
    %cst_48 = arith.constant 1.000000e+00 : f32
    %155 = vector.broadcast %cst_48 : f32 to vector<8x128xf32>
    %156 = arith.subf %154, %155 : vector<8x128xf32>
    %157 = arith.select %12, %156, %152 : vector<8x128xi1>, vector<8x128xf32>
    %158 = vector.extract_strided_slice %157 {offsets = [0, 0], sizes = [8, 32], strides = [1, 1]} : vector<8x128xf32> to vector<8x32xf32>
    %159 = vector.extract_strided_slice %157 {offsets = [0, 32], sizes = [8, 32], strides = [1, 1]} : vector<8x128xf32> to vector<8x32xf32>
    %160 = vector.extract_strided_slice %157 {offsets = [0, 64], sizes = [8, 32], strides = [1, 1]} : vector<8x128xf32> to vector<8x32xf32>
    %161 = vector.extract_strided_slice %157 {offsets = [0, 96], sizes = [8, 32], strides = [1, 1]} : vector<8x128xf32> to vector<8x32xf32>
    %162 = arith.mulf %159, %118 : vector<8x32xf32>
    %163 = arith.mulf %158, %160 : vector<8x32xf32>
    %164 = arith.addf %162, %163 : vector<8x32xf32>
    %165 = math.tanh %164 : vector<8x32xf32>
    %166 = arith.mulf %161, %165 : vector<8x32xf32>
    %c32 = arith.constant 32 : index
    %c0_49 = arith.constant 0 : index
    %167 = vector.load %arg11[%c32, %c0_49] : memref<64x128xf32, #tpu.memory_space<vmem>>, vector<8x128xf32>
    %cst_50 = arith.constant dense<0.000000e+00> : vector<8x128xf32>
    %168 = tpu.matmul %142, %13, %cst_50 {dimension_numbers = #tpu.dot_dimension_numbers<[1], [0], [0], [1], [0, 0, 1, 1], [], []>} : vector<8x32xf32>, vector<32x128xf32>, vector<8x128xf32> -> vector<8x128xf32>
    %169 = arith.addf %167, %168 : vector<8x128xf32>
    %170 = arith.negf %169 : vector<8x128xf32>
    %171 = math.exp %170 : vector<8x128xf32>
    %cst_51 = arith.constant 1.000000e+00 : f32
    %172 = vector.broadcast %cst_51 : f32 to vector<8x128xf32>
    %173 = arith.addf %172, %171 : vector<8x128xf32>
    %174 = arith.divf %172, %173 : vector<8x128xf32>
    %cst_52 = arith.constant 2.000000e+00 : f32
    %175 = vector.broadcast %cst_52 : f32 to vector<8x128xf32>
    %176 = arith.mulf %175, %174 : vector<8x128xf32>
    %cst_53 = arith.constant 1.000000e+00 : f32
    %177 = vector.broadcast %cst_53 : f32 to vector<8x128xf32>
    %178 = arith.subf %176, %177 : vector<8x128xf32>
    %179 = arith.select %12, %178, %174 : vector<8x128xi1>, vector<8x128xf32>
    %180 = vector.extract_strided_slice %179 {offsets = [0, 0], sizes = [8, 32], strides = [1, 1]} : vector<8x128xf32> to vector<8x32xf32>
    %181 = vector.extract_strided_slice %179 {offsets = [0, 32], sizes = [8, 32], strides = [1, 1]} : vector<8x128xf32> to vector<8x32xf32>
    %182 = vector.extract_strided_slice %179 {offsets = [0, 64], sizes = [8, 32], strides = [1, 1]} : vector<8x128xf32> to vector<8x32xf32>
    %183 = vector.extract_strided_slice %179 {offsets = [0, 96], sizes = [8, 32], strides = [1, 1]} : vector<8x128xf32> to vector<8x32xf32>
    %184 = arith.mulf %181, %140 : vector<8x32xf32>
    %185 = arith.mulf %180, %182 : vector<8x32xf32>
    %186 = arith.addf %184, %185 : vector<8x32xf32>
    %187 = math.tanh %186 : vector<8x32xf32>
    %188 = arith.mulf %183, %187 : vector<8x32xf32>
    %cst_54 = arith.constant dense<0.000000e+00> : vector<8x128xf32>
    %189 = tpu.matmul %142, %15, %cst_54 {dimension_numbers = #tpu.dot_dimension_numbers<[1], [0], [0], [1], [0, 0, 1, 1], [], []>} : vector<8x32xf32>, vector<32x128xf32>, vector<8x128xf32> -> vector<8x128xf32>
    %190 = vector.broadcast %16 : vector<1x128xf32> to vector<8x128xf32>
    %191 = arith.addf %189, %190 : vector<8x128xf32>
    %cst_55 = arith.constant dense<0.000000e+00> : vector<8x128xf32>
    %192 = tpu.matmul %166, %14, %cst_55 {dimension_numbers = #tpu.dot_dimension_numbers<[1], [0], [0], [1], [0, 0, 1, 1], [], []>} : vector<8x32xf32>, vector<32x128xf32>, vector<8x128xf32> -> vector<8x128xf32>
    %193 = arith.addf %191, %192 : vector<8x128xf32>
    %194 = arith.negf %193 : vector<8x128xf32>
    %195 = math.exp %194 : vector<8x128xf32>
    %cst_56 = arith.constant 1.000000e+00 : f32
    %196 = vector.broadcast %cst_56 : f32 to vector<8x128xf32>
    %197 = arith.addf %196, %195 : vector<8x128xf32>
    %198 = arith.divf %196, %197 : vector<8x128xf32>
    %cst_57 = arith.constant 2.000000e+00 : f32
    %199 = vector.broadcast %cst_57 : f32 to vector<8x128xf32>
    %200 = arith.mulf %199, %198 : vector<8x128xf32>
    %cst_58 = arith.constant 1.000000e+00 : f32
    %201 = vector.broadcast %cst_58 : f32 to vector<8x128xf32>
    %202 = arith.subf %200, %201 : vector<8x128xf32>
    %203 = arith.select %12, %202, %198 : vector<8x128xi1>, vector<8x128xf32>
    %204 = vector.extract_strided_slice %203 {offsets = [0, 0], sizes = [8, 32], strides = [1, 1]} : vector<8x128xf32> to vector<8x32xf32>
    %205 = vector.extract_strided_slice %203 {offsets = [0, 32], sizes = [8, 32], strides = [1, 1]} : vector<8x128xf32> to vector<8x32xf32>
    %206 = vector.extract_strided_slice %203 {offsets = [0, 64], sizes = [8, 32], strides = [1, 1]} : vector<8x128xf32> to vector<8x32xf32>
    %207 = vector.extract_strided_slice %203 {offsets = [0, 96], sizes = [8, 32], strides = [1, 1]} : vector<8x128xf32> to vector<8x32xf32>
    %208 = arith.mulf %205, %164 : vector<8x32xf32>
    %209 = arith.mulf %204, %206 : vector<8x32xf32>
    %210 = arith.addf %208, %209 : vector<8x32xf32>
    %211 = math.tanh %210 : vector<8x32xf32>
    %212 = arith.mulf %207, %211 : vector<8x32xf32>
    %c40 = arith.constant 40 : index
    %c0_59 = arith.constant 0 : index
    %213 = vector.load %arg11[%c40, %c0_59] : memref<64x128xf32, #tpu.memory_space<vmem>>, vector<8x128xf32>
    %cst_60 = arith.constant dense<0.000000e+00> : vector<8x128xf32>
    %214 = tpu.matmul %188, %13, %cst_60 {dimension_numbers = #tpu.dot_dimension_numbers<[1], [0], [0], [1], [0, 0, 1, 1], [], []>} : vector<8x32xf32>, vector<32x128xf32>, vector<8x128xf32> -> vector<8x128xf32>
    %215 = arith.addf %213, %214 : vector<8x128xf32>
    %216 = arith.negf %215 : vector<8x128xf32>
    %217 = math.exp %216 : vector<8x128xf32>
    %cst_61 = arith.constant 1.000000e+00 : f32
    %218 = vector.broadcast %cst_61 : f32 to vector<8x128xf32>
    %219 = arith.addf %218, %217 : vector<8x128xf32>
    %220 = arith.divf %218, %219 : vector<8x128xf32>
    %cst_62 = arith.constant 2.000000e+00 : f32
    %221 = vector.broadcast %cst_62 : f32 to vector<8x128xf32>
    %222 = arith.mulf %221, %220 : vector<8x128xf32>
    %cst_63 = arith.constant 1.000000e+00 : f32
    %223 = vector.broadcast %cst_63 : f32 to vector<8x128xf32>
    %224 = arith.subf %222, %223 : vector<8x128xf32>
    %225 = arith.select %12, %224, %220 : vector<8x128xi1>, vector<8x128xf32>
    %226 = vector.extract_strided_slice %225 {offsets = [0, 0], sizes = [8, 32], strides = [1, 1]} : vector<8x128xf32> to vector<8x32xf32>
    %227 = vector.extract_strided_slice %225 {offsets = [0, 32], sizes = [8, 32], strides = [1, 1]} : vector<8x128xf32> to vector<8x32xf32>
    %228 = vector.extract_strided_slice %225 {offsets = [0, 64], sizes = [8, 32], strides = [1, 1]} : vector<8x128xf32> to vector<8x32xf32>
    %229 = vector.extract_strided_slice %225 {offsets = [0, 96], sizes = [8, 32], strides = [1, 1]} : vector<8x128xf32> to vector<8x32xf32>
    %230 = arith.mulf %227, %186 : vector<8x32xf32>
    %231 = arith.mulf %226, %228 : vector<8x32xf32>
    %232 = arith.addf %230, %231 : vector<8x32xf32>
    %233 = math.tanh %232 : vector<8x32xf32>
    %234 = arith.mulf %229, %233 : vector<8x32xf32>
    %cst_64 = arith.constant dense<0.000000e+00> : vector<8x128xf32>
    %235 = tpu.matmul %188, %15, %cst_64 {dimension_numbers = #tpu.dot_dimension_numbers<[1], [0], [0], [1], [0, 0, 1, 1], [], []>} : vector<8x32xf32>, vector<32x128xf32>, vector<8x128xf32> -> vector<8x128xf32>
    %236 = vector.broadcast %16 : vector<1x128xf32> to vector<8x128xf32>
    %237 = arith.addf %235, %236 : vector<8x128xf32>
    %cst_65 = arith.constant dense<0.000000e+00> : vector<8x128xf32>
    %238 = tpu.matmul %212, %14, %cst_65 {dimension_numbers = #tpu.dot_dimension_numbers<[1], [0], [0], [1], [0, 0, 1, 1], [], []>} : vector<8x32xf32>, vector<32x128xf32>, vector<8x128xf32> -> vector<8x128xf32>
    %239 = arith.addf %237, %238 : vector<8x128xf32>
    %240 = arith.negf %239 : vector<8x128xf32>
    %241 = math.exp %240 : vector<8x128xf32>
    %cst_66 = arith.constant 1.000000e+00 : f32
    %242 = vector.broadcast %cst_66 : f32 to vector<8x128xf32>
    %243 = arith.addf %242, %241 : vector<8x128xf32>
    %244 = arith.divf %242, %243 : vector<8x128xf32>
    %cst_67 = arith.constant 2.000000e+00 : f32
    %245 = vector.broadcast %cst_67 : f32 to vector<8x128xf32>
    %246 = arith.mulf %245, %244 : vector<8x128xf32>
    %cst_68 = arith.constant 1.000000e+00 : f32
    %247 = vector.broadcast %cst_68 : f32 to vector<8x128xf32>
    %248 = arith.subf %246, %247 : vector<8x128xf32>
    %249 = arith.select %12, %248, %244 : vector<8x128xi1>, vector<8x128xf32>
    %250 = vector.extract_strided_slice %249 {offsets = [0, 0], sizes = [8, 32], strides = [1, 1]} : vector<8x128xf32> to vector<8x32xf32>
    %251 = vector.extract_strided_slice %249 {offsets = [0, 32], sizes = [8, 32], strides = [1, 1]} : vector<8x128xf32> to vector<8x32xf32>
    %252 = vector.extract_strided_slice %249 {offsets = [0, 64], sizes = [8, 32], strides = [1, 1]} : vector<8x128xf32> to vector<8x32xf32>
    %253 = vector.extract_strided_slice %249 {offsets = [0, 96], sizes = [8, 32], strides = [1, 1]} : vector<8x128xf32> to vector<8x32xf32>
    %254 = arith.mulf %251, %210 : vector<8x32xf32>
    %255 = arith.mulf %250, %252 : vector<8x32xf32>
    %256 = arith.addf %254, %255 : vector<8x32xf32>
    %257 = math.tanh %256 : vector<8x32xf32>
    %258 = arith.mulf %253, %257 : vector<8x32xf32>
    %c48 = arith.constant 48 : index
    %c0_69 = arith.constant 0 : index
    %259 = vector.load %arg11[%c48, %c0_69] : memref<64x128xf32, #tpu.memory_space<vmem>>, vector<8x128xf32>
    %cst_70 = arith.constant dense<0.000000e+00> : vector<8x128xf32>
    %260 = tpu.matmul %234, %13, %cst_70 {dimension_numbers = #tpu.dot_dimension_numbers<[1], [0], [0], [1], [0, 0, 1, 1], [], []>} : vector<8x32xf32>, vector<32x128xf32>, vector<8x128xf32> -> vector<8x128xf32>
    %261 = arith.addf %259, %260 : vector<8x128xf32>
    %262 = arith.negf %261 : vector<8x128xf32>
    %263 = math.exp %262 : vector<8x128xf32>
    %cst_71 = arith.constant 1.000000e+00 : f32
    %264 = vector.broadcast %cst_71 : f32 to vector<8x128xf32>
    %265 = arith.addf %264, %263 : vector<8x128xf32>
    %266 = arith.divf %264, %265 : vector<8x128xf32>
    %cst_72 = arith.constant 2.000000e+00 : f32
    %267 = vector.broadcast %cst_72 : f32 to vector<8x128xf32>
    %268 = arith.mulf %267, %266 : vector<8x128xf32>
    %cst_73 = arith.constant 1.000000e+00 : f32
    %269 = vector.broadcast %cst_73 : f32 to vector<8x128xf32>
    %270 = arith.subf %268, %269 : vector<8x128xf32>
    %271 = arith.select %12, %270, %266 : vector<8x128xi1>, vector<8x128xf32>
    %272 = vector.extract_strided_slice %271 {offsets = [0, 0], sizes = [8, 32], strides = [1, 1]} : vector<8x128xf32> to vector<8x32xf32>
    %273 = vector.extract_strided_slice %271 {offsets = [0, 32], sizes = [8, 32], strides = [1, 1]} : vector<8x128xf32> to vector<8x32xf32>
    %274 = vector.extract_strided_slice %271 {offsets = [0, 64], sizes = [8, 32], strides = [1, 1]} : vector<8x128xf32> to vector<8x32xf32>
    %275 = vector.extract_strided_slice %271 {offsets = [0, 96], sizes = [8, 32], strides = [1, 1]} : vector<8x128xf32> to vector<8x32xf32>
    %276 = arith.mulf %273, %232 : vector<8x32xf32>
    %277 = arith.mulf %272, %274 : vector<8x32xf32>
    %278 = arith.addf %276, %277 : vector<8x32xf32>
    %279 = math.tanh %278 : vector<8x32xf32>
    %280 = arith.mulf %275, %279 : vector<8x32xf32>
    %cst_74 = arith.constant dense<0.000000e+00> : vector<8x128xf32>
    %281 = tpu.matmul %234, %15, %cst_74 {dimension_numbers = #tpu.dot_dimension_numbers<[1], [0], [0], [1], [0, 0, 1, 1], [], []>} : vector<8x32xf32>, vector<32x128xf32>, vector<8x128xf32> -> vector<8x128xf32>
    %282 = vector.broadcast %16 : vector<1x128xf32> to vector<8x128xf32>
    %283 = arith.addf %281, %282 : vector<8x128xf32>
    %cst_75 = arith.constant dense<0.000000e+00> : vector<8x128xf32>
    %284 = tpu.matmul %258, %14, %cst_75 {dimension_numbers = #tpu.dot_dimension_numbers<[1], [0], [0], [1], [0, 0, 1, 1], [], []>} : vector<8x32xf32>, vector<32x128xf32>, vector<8x128xf32> -> vector<8x128xf32>
    %285 = arith.addf %283, %284 : vector<8x128xf32>
    %286 = arith.negf %285 : vector<8x128xf32>
    %287 = math.exp %286 : vector<8x128xf32>
    %cst_76 = arith.constant 1.000000e+00 : f32
    %288 = vector.broadcast %cst_76 : f32 to vector<8x128xf32>
    %289 = arith.addf %288, %287 : vector<8x128xf32>
    %290 = arith.divf %288, %289 : vector<8x128xf32>
    %cst_77 = arith.constant 2.000000e+00 : f32
    %291 = vector.broadcast %cst_77 : f32 to vector<8x128xf32>
    %292 = arith.mulf %291, %290 : vector<8x128xf32>
    %cst_78 = arith.constant 1.000000e+00 : f32
    %293 = vector.broadcast %cst_78 : f32 to vector<8x128xf32>
    %294 = arith.subf %292, %293 : vector<8x128xf32>
    %295 = arith.select %12, %294, %290 : vector<8x128xi1>, vector<8x128xf32>
    %296 = vector.extract_strided_slice %295 {offsets = [0, 0], sizes = [8, 32], strides = [1, 1]} : vector<8x128xf32> to vector<8x32xf32>
    %297 = vector.extract_strided_slice %295 {offsets = [0, 32], sizes = [8, 32], strides = [1, 1]} : vector<8x128xf32> to vector<8x32xf32>
    %298 = vector.extract_strided_slice %295 {offsets = [0, 64], sizes = [8, 32], strides = [1, 1]} : vector<8x128xf32> to vector<8x32xf32>
    %299 = vector.extract_strided_slice %295 {offsets = [0, 96], sizes = [8, 32], strides = [1, 1]} : vector<8x128xf32> to vector<8x32xf32>
    %300 = arith.mulf %297, %256 : vector<8x32xf32>
    %301 = arith.mulf %296, %298 : vector<8x32xf32>
    %302 = arith.addf %300, %301 : vector<8x32xf32>
    %303 = math.tanh %302 : vector<8x32xf32>
    %304 = arith.mulf %299, %303 : vector<8x32xf32>
    %c56 = arith.constant 56 : index
    %c0_79 = arith.constant 0 : index
    %305 = vector.load %arg11[%c56, %c0_79] : memref<64x128xf32, #tpu.memory_space<vmem>>, vector<8x128xf32>
    %cst_80 = arith.constant dense<0.000000e+00> : vector<8x128xf32>
    %306 = tpu.matmul %280, %13, %cst_80 {dimension_numbers = #tpu.dot_dimension_numbers<[1], [0], [0], [1], [0, 0, 1, 1], [], []>} : vector<8x32xf32>, vector<32x128xf32>, vector<8x128xf32> -> vector<8x128xf32>
    %307 = arith.addf %305, %306 : vector<8x128xf32>
    %308 = arith.negf %307 : vector<8x128xf32>
    %309 = math.exp %308 : vector<8x128xf32>
    %cst_81 = arith.constant 1.000000e+00 : f32
    %310 = vector.broadcast %cst_81 : f32 to vector<8x128xf32>
    %311 = arith.addf %310, %309 : vector<8x128xf32>
    %312 = arith.divf %310, %311 : vector<8x128xf32>
    %cst_82 = arith.constant 2.000000e+00 : f32
    %313 = vector.broadcast %cst_82 : f32 to vector<8x128xf32>
    %314 = arith.mulf %313, %312 : vector<8x128xf32>
    %cst_83 = arith.constant 1.000000e+00 : f32
    %315 = vector.broadcast %cst_83 : f32 to vector<8x128xf32>
    %316 = arith.subf %314, %315 : vector<8x128xf32>
    %317 = arith.select %12, %316, %312 : vector<8x128xi1>, vector<8x128xf32>
    %318 = vector.extract_strided_slice %317 {offsets = [0, 0], sizes = [8, 32], strides = [1, 1]} : vector<8x128xf32> to vector<8x32xf32>
    %319 = vector.extract_strided_slice %317 {offsets = [0, 32], sizes = [8, 32], strides = [1, 1]} : vector<8x128xf32> to vector<8x32xf32>
    %320 = vector.extract_strided_slice %317 {offsets = [0, 64], sizes = [8, 32], strides = [1, 1]} : vector<8x128xf32> to vector<8x32xf32>
    %321 = vector.extract_strided_slice %317 {offsets = [0, 96], sizes = [8, 32], strides = [1, 1]} : vector<8x128xf32> to vector<8x32xf32>
    %322 = arith.mulf %319, %278 : vector<8x32xf32>
    %323 = arith.mulf %318, %320 : vector<8x32xf32>
    %324 = arith.addf %322, %323 : vector<8x32xf32>
    %325 = math.tanh %324 : vector<8x32xf32>
    %326 = arith.mulf %321, %325 : vector<8x32xf32>
    %cst_84 = arith.constant dense<0.000000e+00> : vector<8x128xf32>
    %327 = tpu.matmul %280, %15, %cst_84 {dimension_numbers = #tpu.dot_dimension_numbers<[1], [0], [0], [1], [0, 0, 1, 1], [], []>} : vector<8x32xf32>, vector<32x128xf32>, vector<8x128xf32> -> vector<8x128xf32>
    %328 = vector.broadcast %16 : vector<1x128xf32> to vector<8x128xf32>
    %329 = arith.addf %327, %328 : vector<8x128xf32>
    %cst_85 = arith.constant dense<0.000000e+00> : vector<8x128xf32>
    %330 = tpu.matmul %304, %14, %cst_85 {dimension_numbers = #tpu.dot_dimension_numbers<[1], [0], [0], [1], [0, 0, 1, 1], [], []>} : vector<8x32xf32>, vector<32x128xf32>, vector<8x128xf32> -> vector<8x128xf32>
    %331 = arith.addf %329, %330 : vector<8x128xf32>
    %332 = arith.negf %331 : vector<8x128xf32>
    %333 = math.exp %332 : vector<8x128xf32>
    %cst_86 = arith.constant 1.000000e+00 : f32
    %334 = vector.broadcast %cst_86 : f32 to vector<8x128xf32>
    %335 = arith.addf %334, %333 : vector<8x128xf32>
    %336 = arith.divf %334, %335 : vector<8x128xf32>
    %cst_87 = arith.constant 2.000000e+00 : f32
    %337 = vector.broadcast %cst_87 : f32 to vector<8x128xf32>
    %338 = arith.mulf %337, %336 : vector<8x128xf32>
    %cst_88 = arith.constant 1.000000e+00 : f32
    %339 = vector.broadcast %cst_88 : f32 to vector<8x128xf32>
    %340 = arith.subf %338, %339 : vector<8x128xf32>
    %341 = arith.select %12, %340, %336 : vector<8x128xi1>, vector<8x128xf32>
    %342 = vector.extract_strided_slice %341 {offsets = [0, 0], sizes = [8, 32], strides = [1, 1]} : vector<8x128xf32> to vector<8x32xf32>
    %343 = vector.extract_strided_slice %341 {offsets = [0, 32], sizes = [8, 32], strides = [1, 1]} : vector<8x128xf32> to vector<8x32xf32>
    %344 = vector.extract_strided_slice %341 {offsets = [0, 64], sizes = [8, 32], strides = [1, 1]} : vector<8x128xf32> to vector<8x32xf32>
    %345 = vector.extract_strided_slice %341 {offsets = [0, 96], sizes = [8, 32], strides = [1, 1]} : vector<8x128xf32> to vector<8x32xf32>
    %346 = arith.mulf %343, %302 : vector<8x32xf32>
    %347 = arith.mulf %342, %344 : vector<8x32xf32>
    %348 = arith.addf %346, %347 : vector<8x32xf32>
    %349 = math.tanh %348 : vector<8x32xf32>
    %350 = arith.mulf %345, %349 : vector<8x32xf32>
    %cst_89 = arith.constant dense<0.000000e+00> : vector<8x128xf32>
    %351 = tpu.matmul %326, %15, %cst_89 {dimension_numbers = #tpu.dot_dimension_numbers<[1], [0], [0], [1], [0, 0, 1, 1], [], []>} : vector<8x32xf32>, vector<32x128xf32>, vector<8x128xf32> -> vector<8x128xf32>
    %352 = vector.broadcast %16 : vector<1x128xf32> to vector<8x128xf32>
    %353 = arith.addf %351, %352 : vector<8x128xf32>
    %cst_90 = arith.constant dense<0.000000e+00> : vector<8x128xf32>
    %354 = tpu.matmul %350, %14, %cst_90 {dimension_numbers = #tpu.dot_dimension_numbers<[1], [0], [0], [1], [0, 0, 1, 1], [], []>} : vector<8x32xf32>, vector<32x128xf32>, vector<8x128xf32> -> vector<8x128xf32>
    %355 = arith.addf %353, %354 : vector<8x128xf32>
    %356 = arith.negf %355 : vector<8x128xf32>
    %357 = math.exp %356 : vector<8x128xf32>
    %cst_91 = arith.constant 1.000000e+00 : f32
    %358 = vector.broadcast %cst_91 : f32 to vector<8x128xf32>
    %359 = arith.addf %358, %357 : vector<8x128xf32>
    %360 = arith.divf %358, %359 : vector<8x128xf32>
    %cst_92 = arith.constant 2.000000e+00 : f32
    %361 = vector.broadcast %cst_92 : f32 to vector<8x128xf32>
    %362 = arith.mulf %361, %360 : vector<8x128xf32>
    %cst_93 = arith.constant 1.000000e+00 : f32
    %363 = vector.broadcast %cst_93 : f32 to vector<8x128xf32>
    %364 = arith.subf %362, %363 : vector<8x128xf32>
    %365 = arith.select %12, %364, %360 : vector<8x128xi1>, vector<8x128xf32>
    %366 = vector.extract_strided_slice %365 {offsets = [0, 0], sizes = [8, 32], strides = [1, 1]} : vector<8x128xf32> to vector<8x32xf32>
    %367 = vector.extract_strided_slice %365 {offsets = [0, 32], sizes = [8, 32], strides = [1, 1]} : vector<8x128xf32> to vector<8x32xf32>
    %368 = vector.extract_strided_slice %365 {offsets = [0, 64], sizes = [8, 32], strides = [1, 1]} : vector<8x128xf32> to vector<8x32xf32>
    %369 = vector.extract_strided_slice %365 {offsets = [0, 96], sizes = [8, 32], strides = [1, 1]} : vector<8x128xf32> to vector<8x32xf32>
    %370 = arith.mulf %367, %348 : vector<8x32xf32>
    %371 = arith.mulf %366, %368 : vector<8x32xf32>
    %372 = arith.addf %370, %371 : vector<8x32xf32>
    %373 = math.tanh %372 : vector<8x32xf32>
    %374 = arith.mulf %369, %373 : vector<8x32xf32>
    %c0_94 = arith.constant 0 : index
    %c0_95 = arith.constant 0 : index
    %375 = vector.load %arg8[%c0_94, %c0_95] : memref<32x2xf32, #tpu.memory_space<vmem>>, vector<32x2xf32>
    %cst_96 = arith.constant dense<0.000000e+00> : vector<8x2xf32>
    %376 = tpu.matmul %374, %375, %cst_96 {dimension_numbers = #tpu.dot_dimension_numbers<[1], [0], [0], [1], [0, 0, 1, 1], [], []>} : vector<8x32xf32>, vector<32x2xf32>, vector<8x2xf32> -> vector<8x2xf32>
    %c0_97 = arith.constant 0 : index
    %c0_98 = arith.constant 0 : index
    %377 = vector.load %arg9[%c0_97, %c0_98] : memref<1x2xf32, #tpu.memory_space<vmem>>, vector<1x2xf32>
    %378 = vector.broadcast %377 : vector<1x2xf32> to vector<8x2xf32>
    %379 = arith.addf %376, %378 : vector<8x2xf32>
    %c0_99 = arith.constant 0 : index
    %c0_100 = arith.constant 0 : index
    %380 = vector.load %arg10[%c0_99, %c0_100] : memref<8x2xf32, #tpu.memory_space<vmem>>, vector<8x2xf32>
    tpu.vector_store %arg10[%c0_99, %c0_100], %379 {strides = array<i32>} : memref<8x2xf32, #tpu.memory_space<vmem>>, vector<8x2xf32>,
    return
  }
  func.func @transform_0(%arg0: i32) -> (i32, i32) {
    %c0_i32 = arith.constant 0 : i32
    %c0_i32_0 = arith.constant 0 : i32
    %c0_i32_1 = arith.constant 0 : i32
    return %c0_i32, %c0_i32_0 : i32, i32
  }
  func.func @transform_1(%arg0: i32) -> (i32, i32) {
    %c0_i32 = arith.constant 0 : i32
    %c0_i32_0 = arith.constant 0 : i32
    %c0_i32_1 = arith.constant 0 : i32
    return %c0_i32, %c0_i32_0 : i32, i32
  }
  func.func @transform_2(%arg0: i32) -> (i32, i32) {
    %c0_i32 = arith.constant 0 : i32
    %c0_i32_0 = arith.constant 0 : i32
    %c0_i32_1 = arith.constant 0 : i32
    return %c0_i32, %c0_i32_0 : i32, i32
  }
  func.func @transform_3(%arg0: i32) -> (i32, i32) {
    %c0_i32 = arith.constant 0 : i32
    %c0_i32_0 = arith.constant 0 : i32
    %c0_i32_1 = arith.constant 0 : i32
    return %c0_i32, %c0_i32_0 : i32, i32
  }
  func.func @transform_4(%arg0: i32) -> (i32, i32) {
    %c0_i32 = arith.constant 0 : i32
    %c0_i32_0 = arith.constant 0 : i32
    %c0_i32_1 = arith.constant 0 : i32
    return %c0_i32, %c0_i32_0 : i32, i32
  }
  func.func @transform_5(%arg0: i32) -> (i32, i32) {
    %c0_i32 = arith.constant 0 : i32
    %c0_i32_0 = arith.constant 0 : i32
    %c0_i32_1 = arith.constant 0 : i32
    return %c0_i32, %c0_i32_0 : i32, i32
  }
  func.func @transform_6(%arg0: i32) -> (i32, i32) {
    %c0_i32 = arith.constant 0 : i32
    %c0_i32_0 = arith.constant 0 : i32
    %c0_i32_1 = arith.constant 0 : i32
    return %c0_i32, %c0_i32_0 : i32, i32
  }
  func.func @transform_7(%arg0: i32) -> (i32, i32) {
    %c0_i32 = arith.constant 0 : i32
    %c0_i32_0 = arith.constant 0 : i32
    %c0_i32_1 = arith.constant 0 : i32
    return %c0_i32, %c0_i32_0 : i32, i32
  }
  func.func @transform_8(%arg0: i32) -> (i32, i32) {
    %c0_i32 = arith.constant 0 : i32
    %c0_i32_0 = arith.constant 0 : i32
    %c0_i32_1 = arith.constant 0 : i32
    return %c0_i32, %c0_i32_0 : i32, i32
  }
  func.func @transform_9(%arg0: i32) -> (i32, i32) {
    %c0_i32 = arith.constant 0 : i32
    %c0_i32_0 = arith.constant 0 : i32
    %c0_i32_1 = arith.constant 0 : i32
    return %c0_i32, %c0_i32_0 : i32, i32
  }
}

</mosaic_0001>

<bundles_post_ra>
// kernel: posenet_forward.1
= control target key start
LH: loop header
LB: loop body
LE: loop exit
PB: predicated region body
PF: predicated region fallthrough
CT: control target
= control target key end

     0   :  { %14 = vsyncpa [#allocation4], 0  ;;  %s2062_s0 = inlined_call_operand.vmem [shape: f32[64,34], index: 0, kind: input, shape index: {}]   ;;  %s2063_s1 = inlined_call_operand.vmem [shape: f32[34,128], index: 1, kind: input, shape index: {}]   ;;  %s2064_s2 = inlined_call_operand.vmem [shape: f32[32,128], index: 2, kind: input, shape index: {}]   ;;  %s2065_s3 = inlined_call_operand.vmem [shape: f32[1,128], index: 3, kind: input, shape index: {}]   ;;  %s2066_s4 = inlined_call_operand.hbm [shape: f32[32,128], index: 4, kind: input, shape index: {}]   ;;  %s2067_s5 = inlined_call_operand.hbm [shape: f32[32,128], index: 5, kind: input, shape index: {}]   ;;  %s2068_s6 = inlined_call_operand.vmem [shape: f32[1,128], index: 6, kind: input, shape index: {}]   ;;  %s2069_s7 = inlined_call_operand.vmem [shape: f32[32,2], index: 7, kind: input, shape index: {}]   ;;  %s2070_s8 = inlined_call_operand.vmem [shape: f32[1,2], index: 8, kind: input, shape index: {}]   ;;  %s2071_s9 = inlined_call_operand.vmem [shape: f32[8,2], index: 9, kind: output, shape index: {}]  }
   0x1   :  { %s28_s11 = sshll.u32 %s2066_s4, 4  ;;  %s29_s11 = int_to_ptr.hbm [resolvable:$true] %s28_s11 }
   0x2   :  { %15 = vsyncpa [#allocation6], 0  ;;  %s1607_s12 = smov [#allocation3]   ;;  %s41_s16 = sshll.u32 %s2067_s5, 4  ;;  %s42_s16 = int_to_ptr.hbm [resolvable:$true] %s41_s16 }
   0x3   :  { %s30_s13 = sshll.u32 %s1607_s12, 4  ;;  %s1608_s17 = smov 128   ;;  %s31_s13 = int_to_ptr.vmem [resolvable:$true] %s30_s13 }
   0x4   :  { %s1609_s18 = smov 8   ;;  %s1610_s19 = smov [#allocation5]  }
   0x5   :  { %36 = dma.hbm_to_vmem [thread:$0]  %s29_s11, 512, %s31_s13, [#allocation4], %s1608_s17, %s1608_s17, %s1609_s18  }
   0x6   :  { %s43_s20 = sshll.u32 %s1610_s19, 4  ;;  %s44_s20 = int_to_ptr.vmem [resolvable:$true] %s43_s20 }
   0x7   :  { %49 = dma.hbm_to_vmem [thread:$0]  %s42_s16, 512, %s44_s20, [#allocation6], %s1608_s17, %s1608_s17, %s1609_s18  }
   0x8   :  { %1603 = dma.done.wait [#allocation4], 512  }
   0x9   :  { %1604 = vsyncadd [#allocation4], 4294966784 }
   0xa   :  { %1605 = dma.done.wait [#allocation6], 512  }
   0xb   :  { %1606 = vsyncadd [#allocation6], 4294966784  ;;  %vm106_vm0 = vcmask 1041408   ;;  %v76_v0 = vld [vmem:[%s2063_s1 + $0x20] sm:$0x3]  ;;  %v75_v1 = vld [vmem:[%s2063_s1 + $0x18] sm:$0xff]  ;;  %v159_v13 = vlaneseq }
   0xc   :  { %1379 = vmatpush.msk.msra.mxu0 %vm106_vm0, %v76_v0  ;;  %v74_v2 = vld [vmem:[%s2063_s1 + $0x10] sm:$0xff]  ;;  %v73_v3 = vld [vmem:[%s2063_s1 + $0x8] sm:$0xff]  ;;  %v72_v4 = vld [vmem:[%s2063_s1] sm:$0xff]  ;;  %vm81_vm1 = vcmask 277504   ;;  %s1611_s1 = smov 64   ;;  %s1612_s12 = smov 32  }
   0xd   :  { %v64_v5 = vld [vmem:[%s2062_s0] sm:$0xff]  ;;  %v160_v17 = vand.u32 127, %v159_v13  ;;  %s1613_s13 = smov 96   ;;  %v1707_v31 = vld [vmem:[%s2064_s2 + $0x18] sm:$0xff]  ;;  %v1714_v33 = vld [vmem:[%s2064_s2 + $0x10] sm:$0xff]  ;;  %vm215_vm9 = vcmask 261120  }
   0xe   :  { %122 = vmatpush.msra.mxu0 %v75_v1  ;;  %v1692_v6 = vld [vmem:[%s2065_s3] ss:$0 sm:$0xff]  ;;  %v1709_v32 = vld [vmem:[#allocation3 + $0x18] sm:$0xff]  ;;  %230 = vmatpush.msra.mxu1 %v1707_v31  ;;  %v1718_v34 = vld [vmem:[#allocation3 + $0x10] sm:$0xff] }
   0xf   :  { %vm161_vm5 = vcmp.ge.s32.totalorder %v160_v17, 64  ;;  %vm162_vm6 = vcmp.lt.s32.totalorder %v160_v17, 96  ;;  %297 = vmatpush.msra.mxu2 %v1709_v32  ;;  %v1723_v35 = vld [vmem:[%s2064_s2 + $0x8] sm:$0xff]  ;;  %356 = vmatpush.msra.mxu3 %v1707_v31  ;;  %v1737_v38 = vld [vmem:[%s2064_s2] sm:$0xff]  ;;  %v1340_v25 = vld [vmem:[%s2069_s7 + $0x10] sm:$0xff] }
  0x10   :  { %123 = vmatpush.msra.mxu0 %v74_v2  ;;  %vm1695_vm8 = vmand %vm161_vm5, %vm162_vm6  ;;  %v1725_v36 = vld [vmem:[#allocation3 + $0x8] sm:$0xff]  ;;  %231 = vmatpush.msra.mxu1 %v1714_v33  ;;  %v1739_v39 = vld [vmem:[#allocation3] sm:$0xff] }
  0x11   :  { %v65_v37 = vld [vmem:[%s2062_s0 + $0x8] sm:$0xff]  ;;  %298 = vmatpush.msra.mxu2 %v1718_v34  ;;  %357 = vmatpush.msra.mxu3 %v1714_v33  ;;  %v1767_v48 = vld [vmem:[%s2068_s6] ss:$0 sm:$0xff] }
  0x12   :  { %124 = vmatpush.msra.mxu0 %v73_v3  ;;  %232 = vmatpush.msra.mxu1 %v1723_v35 }
  0x13   :  { %299 = vmatpush.msra.mxu2 %v1725_v36  ;;  %358 = vmatpush.msra.mxu3 %v1723_v35 }
  0x14   :  { %125 = vmatpush.msra.mxu0 %v72_v4  ;;  %233 = vmatpush.msra.mxu1 %v1737_v38 }
  0x15   :  { %1380 = vmatmul.msk.f32.vlgmr.msra.gmra.mxu0 %vm81_vm1, %v64_v5  ;;  %300 = vmatpush.msra.mxu2 %v1739_v39 }
  0x16   :  { %416 = vmatpush.msrb.mxu1 %v1709_v32  ;;  %359 = vmatpush.msra.mxu3 %v1737_v38 }
  0x18   :  { %511 = vmatpush.msrb.mxu3 %v1707_v31  ;;  %417 = vmatpush.msrb.mxu1 %v1718_v34 }
  0x1a   :  { %512 = vmatpush.msrb.mxu3 %v1714_v33  ;;  %418 = vmatpush.msrb.mxu1 %v1725_v36 }
  0x1c   :  { %513 = vmatpush.msrb.mxu3 %v1723_v35  ;;  %419 = vmatpush.msrb.mxu1 %v1739_v39 }
  0x1d   :  { %1381 = vmatmul.msk.f32.gmra.mxu0 %vm81_vm1, %v65_v37 }
  0x1e   :  { %514 = vmatpush.msrb.mxu3 %v1737_v38 }
  0x92   :  { %v127_v7 = vpop.f32.mrf.mxu0 }
  0x93   :  { %v128_v8 = vadd.f32 %v1692_v6, %v127_v7 }
  0x95   :  { %v1388_v9 = vmul.f32 -1.442695, %v128_v8 }
  0x97   :  { %1453 = vpow2.f32 %v1388_v9 }
  0x9a   :  { %v130_v43 = vpop.f32.mrf.mxu0 }
  0x9b   :  { %v131_v44 = vadd.f32 %v1692_v6, %v130_v43  ;;  %v1794_v43 = vld [vmem:[#allocation5] sm:$0xff] }
  0x9d   :  { %v1454_v10 = vpop.eup %1453 }
  0x9e   :  { %v181_v11 = vadd.f32 1.0, %v1454_v10 }
  0xa0   :  { %1455 = vrcp.f32 %v181_v11  ;;  %v193_v16 = vand.u32 2147483648, %v181_v11  ;;  %v191_v19 = vand.u32 2147483647, %v181_v11  ;;  %vm187_vm3 = vweird.f32 %v181_v11 }
  0xa2   :  { %v194_v21 = vor.u32 1.1754944e-38, %v193_v16  ;;  %vm192_vm7 = vcmp.eq.f32.partialorder %v191_v19, 8.507059e+37 }
  0xa6   :  { %v1456_v12 = vpop.eup %1455 }
  0xa7   :  { %v183_v14 = vmul.f32 %v1456_v12, %v181_v11  ;;  %vm188_vm2 = vweird.f32 %v1456_v12 }
  0xa8   :  { %vm189_vm4 = vmor %vm187_vm3, %vm188_vm2 }
  0xa9   :  { %v184_v15 = vsub.f32 1.0, %v183_v14 }
  0xab   :  { %v185_v18 = vmul.f32 %v1456_v12, %v184_v15 }
  0xad   :  { %v186_v20 = vadd.f32 %v1456_v12, %v185_v18 }
  0xaf   :  { %v190_v22 = vsel %vm189_vm4, %v1456_v12, %v186_v20 }
  0xb0   :  { %v195_v23 = vsel %vm192_vm7, %v194_v21, %v190_v22 }
  0xb1   :  { %v197_v24 = vmul.f32 2.0, %v195_v23 }
  0xb3   :  { %v1389_v26 = vadd.f32 -1.0, %v197_v24 }
  0xb5   :  { %v199_v27 = vsel %vm1695_vm8, %v1389_v26, %v195_v23 }
  0xb6   :  { %201 = vrot.lane.b32.xlu0 %v199_v27, %s1611_s1 }
 0x128   :  { %v202_v28 = vpop.permute.xlu0 %201 }
 0x129   :  { %v204_v29 = vmul.f32 %v202_v28, %v199_v27 }
 0x12b   :  { %1457 = vtanh.f32 %v204_v29  ;;  %262 = vrot.lane.b32.xlu2 %v204_v29, %s1612_s12 }
 0x131   :  { %v1458_v30 = vpop.eup %1457 }
 0x132   :  { %207 = vrot.lane.b32.xlu0 %v1458_v30, %s1613_s13 }
 0x185   :  { %v263_v24 = vpop.permute.xlu2 %262 }
 0x1a4   :  { %v208_v40 = vpop.permute.xlu0 %207 }
 0x1a5   :  { %v210_v41 = vmul.f32 %v208_v40, %v199_v27  ;;  %v1786_v40 = vld [vmem:[#allocation5 + $0x18] sm:$0xff] }
 0x1a6   :  { %441 = vmatpush.msrb.mxu2 %v1786_v40 }
 0x1a7   :  { %213 = vrot.lane.b32.xlu1 %v210_v41, %s1612_s12  ;;  %v1789_v41 = vld [vmem:[#allocation5 + $0x10] sm:$0xff] }
 0x1a8   :  { %442 = vmatpush.msrb.mxu2 %v1789_v41 }
 0x219   :  { %v214_v42 = vpop.permute.xlu1 %213 }
 0x21a   :  { %1390 = vmatmul.msk.f32.vlgmr.msra.gmra.mxu1 %vm215_vm9, %v214_v42  ;;  %1393 = vmatmul.msk.f32.vlgmr.msra.gmra.mxu2 %vm215_vm9, %v214_v42  ;;  %v1791_v42 = vld [vmem:[#allocation5 + $0x8] sm:$0xff] }
 0x21b   :  { %571 = vmatpush.msra.mxu1 %v1709_v32  ;;  %443 = vmatpush.msrb.mxu2 %v1791_v42 }
 0x21d   :  { %572 = vmatpush.msra.mxu1 %v1718_v34  ;;  %444 = vmatpush.msrb.mxu2 %v1794_v43 }
 0x21f   :  { %573 = vmatpush.msra.mxu1 %v1725_v36  ;;  %596 = vmatpush.msra.mxu2 %v1786_v40 }
 0x221   :  { %574 = vmatpush.msra.mxu1 %v1739_v39  ;;  %597 = vmatpush.msra.mxu2 %v1789_v41 }
 0x223   :  { %598 = vmatpush.msra.mxu2 %v1791_v42 }
 0x225   :  { %599 = vmatpush.msra.mxu2 %v1794_v43 }
 0x297   :  { %v235_v45 = vpop.f32.mrf.mxu1 }
 0x298   :  { %v238_v46 = vadd.f32 %v235_v45, %v131_v44 }
 0x29a   :  { %v1391_v47 = vmul.f32 -1.442695, %v238_v46 }
 0x29c   :  { %1459 = vpow2.f32 %v1391_v47  ;;  %v66_v47 = vld [vmem:[%s2062_s0 + $0x10] sm:$0xff] }
 0x29d   :  { %v302_v49 = vpop.f32.mrf.mxu2  ;;  %1382 = vmatmul.msk.f32.gmra.mxu0 %vm81_vm1, %v66_v47 }
 0x29e   :  { %v303_v50 = vadd.f32 %v1767_v48, %v302_v49 }
 0x2a0   :  { %v1394_v51 = vmul.f32 -1.442695, %v303_v50 }
 0x2a2   :  { %v1460_v52 = vpop.eup %1459  ;;  %1461 = vpow2.f32 %v1394_v51 }
 0x2a3   :  { %v242_v53 = vadd.f32 1.0, %v1460_v52 }
 0x2a5   :  { %1463 = vrcp.f32 %v242_v53  ;;  %v254_v59 = vand.u32 2147483648, %v242_v53  ;;  %v252_v61 = vand.u32 2147483647, %v242_v53  ;;  %vm248_vm11 = vweird.f32 %v242_v53 }
 0x2a7   :  { %v255_v1 = vor.u32 1.1754944e-38, %v254_v59  ;;  %vm253_vm13 = vcmp.eq.f32.partialorder %v252_v61, 8.507059e+37 }
 0x2a8   :  { %v1462_v54 = vpop.eup %1461 }
 0x2a9   :  { %v308_v55 = vadd.f32 1.0, %v1462_v54 }
 0x2ab   :  { %v1464_v56 = vpop.eup %1463  ;;  %1465 = vrcp.f32 %v308_v55  ;;  %v320_v5 = vand.u32 2147483648, %v308_v55  ;;  %v318_v9 = vand.u32 2147483647, %v308_v55  ;;  %vm314_vm15 = vweird.f32 %v308_v55 }
 0x2ac   :  { %v244_v57 = vmul.f32 %v1464_v56, %v242_v53  ;;  %vm249_vm10 = vweird.f32 %v1464_v56 }
 0x2ad   :  { %vm250_vm12 = vmor %vm248_vm11, %vm249_vm10  ;;  %v321_v12 = vor.u32 1.1754944e-38, %v320_v5  ;;  %vm319_vm2 = vcmp.eq.f32.partialorder %v318_v9, 8.507059e+37 }
 0x2ae   :  { %v245_v58 = vsub.f32 1.0, %v244_v57 }
 0x2b0   :  { %v246_v60 = vmul.f32 %v1464_v56, %v245_v58 }
 0x2b1   :  { %v1466_v62 = vpop.eup %1465 }
 0x2b2   :  { %v247_v63 = vadd.f32 %v1464_v56, %v246_v60  ;;  %v310_v0 = vmul.f32 %v1466_v62, %v308_v55  ;;  %vm315_vm14 = vweird.f32 %v1466_v62 }
 0x2b3   :  { %vm316_vm0 = vmor %vm314_vm15, %vm315_vm14 }
 0x2b4   :  { %v251_v2 = vsel %vm250_vm12, %v1464_v56, %v247_v63  ;;  %v311_v3 = vsub.f32 1.0, %v310_v0 }
 0x2b5   :  { %v256_v4 = vsel %vm253_vm13, %v255_v1, %v251_v2 }
 0x2b6   :  { %v258_v7 = vmul.f32 2.0, %v256_v4  ;;  %v312_v8 = vmul.f32 %v1466_v62, %v311_v3 }
 0x2b8   :  { %v1392_v10 = vadd.f32 -1.0, %v258_v7  ;;  %v313_v11 = vadd.f32 %v1466_v62, %v312_v8 }
 0x2ba   :  { %v260_v13 = vsel %vm1695_vm8, %v1392_v10, %v256_v4  ;;  %v317_v14 = vsel %vm316_vm0, %v1466_v62, %v313_v11 }
 0x2bb   :  { %267 = vrot.lane.b32.xlu1 %v260_v13, %s1611_s1  ;;  %v322_v15 = vsel %vm319_vm2, %v321_v12, %v317_v14  ;;  %v265_v26 = vmul.f32 %v263_v24, %v260_v13 }
 0x2bc   :  { %v324_v16 = vmul.f32 2.0, %v322_v15 }
 0x2be   :  { %v1395_v17 = vadd.f32 -1.0, %v324_v16 }
 0x2c0   :  { %v326_v18 = vsel %vm1695_vm8, %v1395_v17, %v322_v15 }
 0x2c1   :  { %328 = vrot.lane.b32.xlu0 %v326_v18, %s1611_s1 }
 0x31a   :  { %v133_v51 = vpop.f32.mrf.mxu0 }
 0x31b   :  { %v134_v55 = vadd.f32 %v1692_v6, %v133_v51 }
 0x32d   :  { %v268_v19 = vpop.permute.xlu1 %267 }
 0x32e   :  { %v270_v20 = vmul.f32 %v268_v19, %v260_v13 }
 0x330   :  { %272 = vrot.lane.b32.xlu2 %v270_v20, %s1612_s12 }
 0x333   :  { %v329_v21 = vpop.permute.xlu0 %328 }
 0x334   :  { %v1777_v22 = vmul.f32 %v329_v21, %v326_v18 }
 0x336   :  { %1467 = vtanh.f32 %v1777_v22 }
 0x33c   :  { %v1468_v23 = vpop.eup %1467 }
 0x33d   :  { %334 = vrot.lane.b32.xlu2 %v1468_v23, %s1613_s13 }
 0x38a   :  { %v273_v27 = vpop.permute.xlu2 %272 }
 0x38b   :  { %v1781_v28 = vadd.f32 %v273_v27, %v265_v26 }
 0x38d   :  { %1469 = vtanh.f32 %v1781_v28 }
 0x393   :  { %v1470_v29 = vpop.eup %1469 }
 0x394   :  { %278 = vrot.lane.b32.xlu1 %v1470_v29, %s1611_s1 }
 0x397   :  { %v335_v30 = vpop.permute.xlu2 %334 }
 0x398   :  { %v337_v37 = vmul.f32 %v335_v30, %v326_v18 }
 0x39c   :  { %425 = vrot.lane.b32.xlu1 %v337_v37, %s1612_s12 }
 0x406   :  { %v279_v44 = vpop.permute.xlu1 %278 }
 0x407   :  { %v281_v45 = vmul.f32 %v279_v44, %v260_v13 }
 0x409   :  { %340 = vrot.lane.b32.xlu0 %v281_v45, %s1612_s12 }
 0x40e   :  { %v426_v46 = vpop.permute.xlu1 %425 }
 0x40f   :  { %1400 = vmatmul.msk.f32.vlgmr.msrb.gmra.mxu2 %vm215_vm9, %v426_v46 }
 0x410   :  { %747 = vmatpush.msrb.mxu2 %v1786_v40 }
 0x412   :  { %748 = vmatpush.msrb.mxu2 %v1789_v41 }
 0x414   :  { %749 = vmatpush.msrb.mxu2 %v1791_v42 }
 0x416   :  { %750 = vmatpush.msrb.mxu2 %v1794_v43 }
 0x47b   :  { %v341_v49 = vpop.permute.xlu0 %340 }
 0x47c   :  { %1396 = vmatmul.msk.f32.vlgmr.msra.gmra.mxu3 %vm215_vm9, %v341_v49  ;;  %1399 = vmatmul.msk.f32.vlgmr.msrb.gmra.mxu1 %vm215_vm9, %v341_v49 }
 0x47d   :  { %662 = vmatpush.msra.mxu3 %v1707_v31  ;;  %722 = vmatpush.msrb.mxu1 %v1709_v32 }
 0x47f   :  { %663 = vmatpush.msra.mxu3 %v1714_v33  ;;  %723 = vmatpush.msrb.mxu1 %v1718_v34 }
 0x481   :  { %664 = vmatpush.msra.mxu3 %v1723_v35  ;;  %724 = vmatpush.msrb.mxu1 %v1725_v36 }
 0x483   :  { %665 = vmatpush.msra.mxu3 %v1737_v38  ;;  %725 = vmatpush.msrb.mxu1 %v1739_v39 }
 0x492   :  { %v446_v53 = vpop.f32.mrf.mxu2 }
 0x4f9   :  { %v421_v50 = vpop.f32.mrf.mxu1 }
 0x4fa   :  { %v422_v52 = vadd.f32 %v1767_v48, %v421_v50 }
 0x4fc   :  { %v449_v54 = vadd.f32 %v446_v53, %v422_v52 }
 0x4fe   :  { %v1401_v56 = vmul.f32 -1.442695, %v449_v54 }
 0x4ff   :  { %v361_v57 = vpop.f32.mrf.mxu3 }
 0x500   :  { %1471 = vpow2.f32 %v1401_v56  ;;  %v364_v58 = vadd.f32 %v361_v57, %v134_v55 }
 0x502   :  { %v1397_v59 = vmul.f32 -1.442695, %v364_v58  ;;  %v67_v58 = vld [vmem:[%s2062_s0 + $0x18] sm:$0xff] }
 0x503   :  { %1383 = vmatmul.msk.f32.gmra.mxu0 %vm81_vm1, %v67_v58 }
 0x504   :  { %1473 = vpow2.f32 %v1397_v59 }
 0x506   :  { %v1472_v60 = vpop.eup %1471 }
 0x507   :  { %v453_v61 = vadd.f32 1.0, %v1472_v60 }
 0x509   :  { %1475 = vrcp.f32 %v453_v61  ;;  %v463_v4 = vand.u32 2147483647, %v453_v61  ;;  %v465_v5 = vand.u32 2147483648, %v453_v61  ;;  %vm459_vm4 = vweird.f32 %v453_v61 }
 0x50a   :  { %v1474_v62 = vpop.eup %1473 }
 0x50b   :  { %v368_v63 = vadd.f32 1.0, %v1474_v62  ;;  %vm464_vm6 = vcmp.eq.f32.partialorder %v463_v4, 8.507059e+37  ;;  %v466_v11 = vor.u32 1.1754944e-38, %v465_v5 }
 0x50d   :  { %1477 = vrcp.f32 %v368_v63  ;;  %v380_v12 = vand.u32 2147483648, %v368_v63  ;;  %v378_v15 = vand.u32 2147483647, %v368_v63  ;;  %vm374_vm10 = vweird.f32 %v368_v63 }
 0x50f   :  { %v1476_v0 = vpop.eup %1475  ;;  %v381_v19 = vor.u32 1.1754944e-38, %v380_v12  ;;  %vm379_vm12 = vcmp.eq.f32.partialorder %v378_v15, 8.507059e+37 }
 0x510   :  { %v455_v1 = vmul.f32 %v1476_v0, %v453_v61  ;;  %vm460_vm3 = vweird.f32 %v1476_v0 }
 0x511   :  { %vm461_vm5 = vmor %vm459_vm4, %vm460_vm3 }
 0x512   :  { %v456_v2 = vsub.f32 1.0, %v455_v1 }
 0x513   :  { %v1478_v3 = vpop.eup %1477 }
 0x514   :  { %v370_v7 = vmul.f32 %v1478_v3, %v368_v63  ;;  %v457_v8 = vmul.f32 %v1476_v0, %v456_v2  ;;  %vm375_vm7 = vweird.f32 %v1478_v3 }
 0x515   :  { %vm376_vm11 = vmor %vm374_vm10, %vm375_vm7 }
 0x516   :  { %v371_v9 = vsub.f32 1.0, %v370_v7  ;;  %v458_v10 = vadd.f32 %v1476_v0, %v457_v8 }
 0x518   :  { %v462_v13 = vsel %vm461_vm5, %v1476_v0, %v458_v10  ;;  %v372_v14 = vmul.f32 %v1478_v3, %v371_v9 }
 0x519   :  { %v467_v16 = vsel %vm464_vm6, %v466_v11, %v462_v13 }
 0x51a   :  { %v469_v17 = vmul.f32 2.0, %v467_v16  ;;  %v373_v18 = vadd.f32 %v1478_v3, %v372_v14 }
 0x51c   :  { %v1402_v20 = vadd.f32 -1.0, %v469_v17  ;;  %v377_v21 = vsel %vm376_vm11, %v1478_v3, %v373_v18 }
 0x51d   :  { %v382_v23 = vsel %vm379_vm12, %v381_v19, %v377_v21 }
 0x51e   :  { %v471_v24 = vsel %vm1695_vm8, %v1402_v20, %v467_v16  ;;  %v384_v26 = vmul.f32 2.0, %v382_v23 }
 0x51f   :  { %478 = vrot.lane.b32.xlu0 %v471_v24, %s1611_s1 }
 0x520   :  { %v1398_v27 = vadd.f32 -1.0, %v384_v26 }
 0x522   :  { %v386_v29 = vsel %vm1695_vm8, %v1398_v27, %v382_v23 }
 0x523   :  { %389 = vrot.lane.b32.xlu2 %v386_v29, %s1611_s1  ;;  %v387_v46 = vmul.f32 %v386_v29, %v1781_v28 }
 0x52b   :  { %473 = vrot.lane.b32.xlu2 %v1777_v22, %s1612_s12 }
 0x57d   :  { %v390_v30 = vpop.permute.xlu2 %389 }
 0x57e   :  { %v392_v37 = vmul.f32 %v390_v30, %v386_v29 }
 0x580   :  { %394 = vrot.lane.b32.xlu1 %v392_v37, %s1612_s12  ;;  %v136_v62 = vpop.f32.mrf.mxu0 }
 0x581   :  { %v137_v2 = vadd.f32 %v1692_v6, %v136_v62 }
 0x585   :  { %v474_v51 = vpop.permute.xlu2 %473 }
 0x586   :  { %v476_v22 = vmul.f32 %v474_v51, %v471_v24 }
 0x591   :  { %v479_v44 = vpop.permute.xlu0 %478 }
 0x592   :  { %v481_v45 = vmul.f32 %v479_v44, %v471_v24 }
 0x594   :  { %483 = vrot.lane.b32.xlu0 %v481_v45, %s1612_s12 }
 0x5f2   :  { %v395_v47 = vpop.permute.xlu1 %394 }
 0x5f3   :  { %v1835_v49 = vadd.f32 %v395_v47, %v387_v46 }
 0x5f5   :  { %1479 = vtanh.f32 %v1835_v49 }
 0x5fb   :  { %v1480_v50 = vpop.eup %1479 }
 0x5fc   :  { %400 = vrot.lane.b32.xlu1 %v1480_v50, %s1611_s1 }
 0x606   :  { %v484_v52 = vpop.permute.xlu0 %483 }
 0x607   :  { %v1839_v53 = vadd.f32 %v484_v52, %v476_v22 }
 0x609   :  { %1481 = vtanh.f32 %v1839_v53 }
 0x60f   :  { %v1482_v54 = vpop.eup %1481 }
 0x610   :  { %489 = vrot.lane.b32.xlu2 %v1482_v54, %s1611_s1 }
 0x66a   :  { %v490_v55 = vpop.permute.xlu2 %489 }
 0x66b   :  { %v492_v28 = vmul.f32 %v490_v55, %v471_v24 }
 0x66d   :  { %580 = vrot.lane.b32.xlu1 %v492_v28, %s1612_s12 }
 0x66e   :  { %v401_v56 = vpop.permute.xlu1 %400 }
 0x66f   :  { %v403_v57 = vmul.f32 %v401_v56, %v386_v29 }
 0x671   :  { %495 = vrot.lane.b32.xlu0 %v403_v57, %s1612_s12 }
 0x6df   :  { %v581_v59 = vpop.permute.xlu1 %580 }
 0x6e0   :  { %1407 = vmatmul.msk.f32.vlgmr.msra.gmra.mxu2 %vm215_vm9, %v581_v59 }
 0x6e1   :  { %898 = vmatpush.msra.mxu2 %v1786_v40 }
 0x6e3   :  { %v496_v60 = vpop.permute.xlu0 %495  ;;  %899 = vmatpush.msra.mxu2 %v1789_v41 }
 0x6e4   :  { %1403 = vmatmul.msk.f32.vlgmr.msrb.gmra.mxu3 %vm215_vm9, %v496_v60  ;;  %1406 = vmatmul.msk.f32.vlgmr.msra.gmra.mxu1 %vm215_vm9, %v496_v60 }
 0x6e5   :  { %813 = vmatpush.msrb.mxu3 %v1707_v31  ;;  %873 = vmatpush.msra.mxu1 %v1709_v32 }
 0x6e6   :  { %900 = vmatpush.msra.mxu2 %v1791_v42 }
 0x6e7   :  { %814 = vmatpush.msrb.mxu3 %v1714_v33  ;;  %874 = vmatpush.msra.mxu1 %v1718_v34 }
 0x6e8   :  { %901 = vmatpush.msra.mxu2 %v1794_v43 }
 0x6e9   :  { %815 = vmatpush.msrb.mxu3 %v1723_v35  ;;  %875 = vmatpush.msra.mxu1 %v1725_v36 }
 0x6eb   :  { %816 = vmatpush.msrb.mxu3 %v1737_v38  ;;  %876 = vmatpush.msra.mxu1 %v1739_v39 }
 0x761   :  { %v576_v61 = vpop.f32.mrf.mxu1 }
 0x762   :  { %v577_v63 = vadd.f32 %v1767_v48, %v576_v61 }
 0x763   :  { %v601_v0 = vpop.f32.mrf.mxu2 }
 0x764   :  { %v604_v1 = vadd.f32 %v601_v0, %v577_v63 }
 0x766   :  { %v1408_v3 = vmul.f32 -1.442695, %v604_v1 }
 0x767   :  { %v516_v4 = vpop.f32.mrf.mxu3 }
 0x768   :  { %1483 = vpow2.f32 %v1408_v3  ;;  %v519_v5 = vadd.f32 %v516_v4, %v137_v2 }
 0x76a   :  { %v1404_v7 = vmul.f32 -1.442695, %v519_v5 }
 0x76c   :  { %1485 = vpow2.f32 %v1404_v7 }
 0x76e   :  { %v1484_v8 = vpop.eup %1483 }
 0x76f   :  { %v608_v9 = vadd.f32 1.0, %v1484_v8 }
 0x771   :  { %1487 = vrcp.f32 %v608_v9  ;;  %v618_v16 = vand.u32 2147483647, %v608_v9  ;;  %v620_v17 = vand.u32 2147483648, %v608_v9  ;;  %vm614_vm14 = vweird.f32 %v608_v9 }
 0x772   :  { %v1486_v10 = vpop.eup %1485 }
 0x773   :  { %v523_v11 = vadd.f32 1.0, %v1486_v10  ;;  %vm619_vm0 = vcmp.eq.f32.partialorder %v618_v16, 8.507059e+37  ;;  %v621_v23 = vor.u32 1.1754944e-38, %v620_v17 }
 0x775   :  { %1489 = vrcp.f32 %v523_v11  ;;  %v535_v24 = vand.u32 2147483648, %v523_v11  ;;  %v533_v29 = vand.u32 2147483647, %v523_v11  ;;  %vm529_vm3 = vweird.f32 %v523_v11 }
 0x777   :  { %v1488_v12 = vpop.eup %1487  ;;  %v536_v45 = vor.u32 1.1754944e-38, %v535_v24  ;;  %vm534_vm5 = vcmp.eq.f32.partialorder %v533_v29, 8.507059e+37 }
 0x778   :  { %v610_v13 = vmul.f32 %v1488_v12, %v608_v9  ;;  %vm615_vm13 = vweird.f32 %v1488_v12 }
 0x779   :  { %vm616_vm15 = vmor %vm614_vm14, %vm615_vm13 }
 0x77a   :  { %v611_v14 = vsub.f32 1.0, %v610_v13 }
 0x77b   :  { %v1490_v15 = vpop.eup %1489 }
 0x77c   :  { %v525_v18 = vmul.f32 %v1490_v15, %v523_v11  ;;  %v612_v19 = vmul.f32 %v1488_v12, %v611_v14  ;;  %vm530_vm2 = vweird.f32 %v1490_v15 }
 0x77d   :  { %vm531_vm4 = vmor %vm529_vm3, %vm530_vm2 }
 0x77e   :  { %v526_v20 = vsub.f32 1.0, %v525_v18  ;;  %v613_v21 = vadd.f32 %v1488_v12, %v612_v19 }
 0x780   :  { %v617_v26 = vsel %vm616_vm15, %v1488_v12, %v613_v21  ;;  %v527_v27 = vmul.f32 %v1490_v15, %v526_v20 }
 0x781   :  { %v622_v30 = vsel %vm619_vm0, %v621_v23, %v617_v26 }
 0x782   :  { %v624_v37 = vmul.f32 2.0, %v622_v30  ;;  %v528_v44 = vadd.f32 %v1490_v15, %v527_v27 }
 0x784   :  { %v1409_v46 = vadd.f32 -1.0, %v624_v37  ;;  %v532_v47 = vsel %vm531_vm4, %v1490_v15, %v528_v44 }
 0x785   :  { %v537_v50 = vsel %vm534_vm5, %v536_v45, %v532_v47 }
 0x786   :  { %v626_v51 = vsel %vm1695_vm8, %v1409_v46, %v622_v30  ;;  %v539_v22 = vmul.f32 2.0, %v537_v50 }
 0x787   :  { %629 = vrot.lane.b32.xlu0 %v626_v51, %s1611_s1  ;;  %v627_v58 = vmul.f32 %v626_v51, %v1839_v53 }
 0x788   :  { %v1405_v52 = vadd.f32 -1.0, %v539_v22 }
 0x78a   :  { %v541_v54 = vsel %vm1695_vm8, %v1405_v52, %v537_v50 }
 0x78b   :  { %544 = vrot.lane.b32.xlu2 %v541_v54, %s1611_s1  ;;  %v542_v61 = vmul.f32 %v541_v54, %v1835_v49  ;;  %v68_v49 = vld [vmem:[%s2062_s0 + $0x20] sm:$0xff] }
 0x78c   :  { %1384 = vmatmul.msk.f32.gmra.mxu0 %vm81_vm1, %v68_v49 }
 0x7e5   :  { %v545_v55 = vpop.permute.xlu2 %544 }
 0x7e6   :  { %v547_v28 = vmul.f32 %v545_v55, %v541_v54 }
 0x7e8   :  { %549 = vrot.lane.b32.xlu1 %v547_v28, %s1612_s12 }
 0x7f9   :  { %v630_v56 = vpop.permute.xlu0 %629 }
 0x7fa   :  { %v632_v57 = vmul.f32 %v630_v56, %v626_v51 }
 0x7fc   :  { %634 = vrot.lane.b32.xlu2 %v632_v57, %s1612_s12 }
 0x809   :  { %v139_v8 = vpop.f32.mrf.mxu0 }
 0x80a   :  { %v140_v9 = vadd.f32 %v1692_v6, %v139_v8 }
 0x856   :  { %v635_v59 = vpop.permute.xlu2 %634 }
 0x857   :  { %v1875_v60 = vadd.f32 %v635_v59, %v627_v58 }
 0x859   :  { %1491 = vtanh.f32 %v1875_v60 }
 0x85a   :  { %v550_v62 = vpop.permute.xlu1 %549 }
 0x85b   :  { %v1879_v63 = vadd.f32 %v550_v62, %v542_v61 }
 0x85d   :  { %1493 = vtanh.f32 %v1879_v63 }
 0x85f   :  { %v1492_v0 = vpop.eup %1491 }
 0x860   :  { %640 = vrot.lane.b32.xlu1 %v1492_v0, %s1611_s1 }
 0x863   :  { %v1494_v1 = vpop.eup %1493 }
 0x864   :  { %555 = vrot.lane.b32.xlu0 %v1494_v1, %s1611_s1 }
 0x8d2   :  { %v641_v2 = vpop.permute.xlu1 %640 }
 0x8d3   :  { %v643_v53 = vmul.f32 %v641_v2, %v626_v51 }
 0x8d5   :  { %731 = vrot.lane.b32.xlu0 %v643_v53, %s1612_s12 }
 0x8d6   :  { %v556_v3 = vpop.permute.xlu0 %555 }
 0x8d7   :  { %v558_v4 = vmul.f32 %v556_v3, %v541_v54 }
 0x8d9   :  { %646 = vrot.lane.b32.xlu2 %v558_v4, %s1612_s12 }
 0x933   :  { %v647_v5 = vpop.permute.xlu2 %646 }
 0x934   :  { %1410 = vmatmul.msk.f32.vlgmr.msra.gmra.mxu3 %vm215_vm9, %v647_v5  ;;  %1413 = vmatmul.msk.f32.vlgmr.msrb.gmra.mxu1 %vm215_vm9, %v647_v5 }
 0x935   :  { %964 = vmatpush.msra.mxu3 %v1707_v31  ;;  %1024 = vmatpush.msrb.mxu1 %v1709_v32 }
 0x937   :  { %965 = vmatpush.msra.mxu3 %v1714_v33  ;;  %1025 = vmatpush.msrb.mxu1 %v1718_v34 }
 0x939   :  { %966 = vmatpush.msra.mxu3 %v1723_v35  ;;  %1026 = vmatpush.msrb.mxu1 %v1725_v36 }
 0x93b   :  { %967 = vmatpush.msra.mxu3 %v1737_v38  ;;  %1027 = vmatpush.msrb.mxu1 %v1739_v39 }
 0x947   :  { %v732_v7 = vpop.permute.xlu0 %731 }
 0x948   :  { %1414 = vmatmul.msk.f32.vlgmr.msrb.gmra.mxu2 %vm215_vm9, %v732_v7 }
 0x949   :  { %1049 = vmatpush.msrb.mxu2 %v1786_v40 }
 0x94b   :  { %1050 = vmatpush.msrb.mxu2 %v1789_v41 }
 0x94d   :  { %1051 = vmatpush.msrb.mxu2 %v1791_v42 }
 0x94f   :  { %1052 = vmatpush.msrb.mxu2 %v1794_v43 }
 0x9b1   :  { %v727_v15 = vpop.f32.mrf.mxu1 }
 0x9b2   :  { %v728_v16 = vadd.f32 %v1767_v48, %v727_v15 }
 0x9b7   :  { %v667_v10 = vpop.f32.mrf.mxu3 }
 0x9b8   :  { %v670_v11 = vadd.f32 %v667_v10, %v140_v9 }
 0x9ba   :  { %v1411_v12 = vmul.f32 -1.442695, %v670_v11 }
 0x9bc   :  { %1495 = vpow2.f32 %v1411_v12 }
 0x9c2   :  { %v1496_v13 = vpop.eup %1495 }
 0x9c3   :  { %v674_v14 = vadd.f32 1.0, %v1496_v13 }
 0x9c5   :  { %1497 = vrcp.f32 %v674_v14  ;;  %v686_v24 = vand.u32 2147483648, %v674_v14  ;;  %v684_v27 = vand.u32 2147483647, %v674_v14  ;;  %vm680_vm7 = vweird.f32 %v674_v14 }
 0x9c7   :  { %v687_v30 = vor.u32 1.1754944e-38, %v686_v24  ;;  %vm685_vm11 = vcmp.eq.f32.partialorder %v684_v27, 8.507059e+37 }
 0x9cb   :  { %v1498_v17 = vpop.eup %1497  ;;  %v752_v18 = vpop.f32.mrf.mxu2 }
 0x9cc   :  { %v676_v19 = vmul.f32 %v1498_v17, %v674_v14  ;;  %v755_v20 = vadd.f32 %v752_v18, %v728_v16  ;;  %vm681_vm6 = vweird.f32 %v1498_v17 }
 0x9cd   :  { %vm682_vm10 = vmor %vm680_vm7, %vm681_vm6 }
 0x9ce   :  { %v677_v21 = vsub.f32 1.0, %v676_v19  ;;  %v1415_v23 = vmul.f32 -1.442695, %v755_v20 }
 0x9d0   :  { %1499 = vpow2.f32 %v1415_v23  ;;  %v678_v26 = vmul.f32 %v1498_v17, %v677_v21 }
 0x9d2   :  { %v679_v29 = vadd.f32 %v1498_v17, %v678_v26 }
 0x9d4   :  { %v683_v37 = vsel %vm682_vm10, %v1498_v17, %v679_v29 }
 0x9d5   :  { %v688_v44 = vsel %vm685_vm11, %v687_v30, %v683_v37 }
 0x9d6   :  { %v1500_v45 = vpop.eup %1499  ;;  %v690_v46 = vmul.f32 2.0, %v688_v44 }
 0x9d7   :  { %v759_v47 = vadd.f32 1.0, %v1500_v45 }
 0x9d8   :  { %v1412_v50 = vadd.f32 -1.0, %v690_v46 }
 0x9d9   :  { %1501 = vrcp.f32 %v759_v47  ;;  %v771_v55 = vand.u32 2147483648, %v759_v47  ;;  %v769_v56 = vand.u32 2147483647, %v759_v47  ;;  %vm765_vm13 = vweird.f32 %v759_v47 }
 0x9da   :  { %v692_v51 = vsel %vm1695_vm8, %v1412_v50, %v688_v44 }
 0x9db   :  { %695 = vrot.lane.b32.xlu1 %v692_v51, %s1611_s1  ;;  %v772_v58 = vor.u32 1.1754944e-38, %v771_v55  ;;  %vm770_vm15 = vcmp.eq.f32.partialorder %v769_v56, 8.507059e+37  ;;  %v693_v8 = vmul.f32 %v692_v51, %v1879_v63  ;;  %v69_v63 = vld [vmem:[%s2062_s0 + $0x28] sm:$0xff] }
 0x9dc   :  { %1385 = vmatmul.msk.f32.gmra.mxu0 %vm81_vm1, %v69_v63 }
 0x9df   :  { %v1502_v22 = vpop.eup %1501 }
 0x9e0   :  { %v761_v52 = vmul.f32 %v1502_v22, %v759_v47  ;;  %vm766_vm12 = vweird.f32 %v1502_v22 }
 0x9e1   :  { %vm767_vm14 = vmor %vm765_vm13, %vm766_vm12 }
 0x9e2   :  { %v762_v54 = vsub.f32 1.0, %v761_v52 }
 0x9e4   :  { %v763_v28 = vmul.f32 %v1502_v22, %v762_v54 }
 0x9e6   :  { %v764_v57 = vadd.f32 %v1502_v22, %v763_v28 }
 0x9e8   :  { %v768_v59 = vsel %vm767_vm14, %v1502_v22, %v764_v57 }
 0x9e9   :  { %v773_v61 = vsel %vm770_vm15, %v772_v58, %v768_v59 }
 0x9ea   :  { %v775_v62 = vmul.f32 2.0, %v773_v61 }
 0x9ec   :  { %v1416_v0 = vadd.f32 -1.0, %v775_v62 }
 0x9ee   :  { %v777_v1 = vsel %vm1695_vm8, %v1416_v0, %v773_v61 }
 0x9ef   :  { %780 = vrot.lane.b32.xlu2 %v777_v1, %s1611_s1  ;;  %v778_v49 = vmul.f32 %v777_v1, %v1875_v60 }
 0xa49   :  { %v781_v2 = vpop.permute.xlu2 %780 }
 0xa4a   :  { %v783_v53 = vmul.f32 %v781_v2, %v777_v1 }
 0xa4c   :  { %785 = vrot.lane.b32.xlu1 %v783_v53, %s1612_s12 }
 0xa4d   :  { %v696_v3 = vpop.permute.xlu1 %695 }
 0xa4e   :  { %v698_v4 = vmul.f32 %v696_v3, %v692_v51 }
 0xa50   :  { %700 = vrot.lane.b32.xlu0 %v698_v4, %s1612_s12 }
 0xabe   :  { %v786_v5 = vpop.permute.xlu1 %785 }
 0xabf   :  { %v1916_v7 = vadd.f32 %v786_v5, %v778_v49 }
 0xac1   :  { %1503 = vtanh.f32 %v1916_v7 }
 0xac2   :  { %v701_v9 = vpop.permute.xlu0 %700 }
 0xac3   :  { %v1920_v10 = vadd.f32 %v701_v9, %v693_v8 }
 0xac5   :  { %1505 = vtanh.f32 %v1920_v10 }
 0xac7   :  { %v1504_v11 = vpop.eup %1503 }
 0xac8   :  { %791 = vrot.lane.b32.xlu0 %v1504_v11, %s1611_s1 }
 0xacb   :  { %v1506_v12 = vpop.eup %1505 }
 0xacc   :  { %706 = vrot.lane.b32.xlu2 %v1506_v12, %s1611_s1 }
 0xb26   :  { %v707_v13 = vpop.permute.xlu2 %706 }
 0xb27   :  { %v709_v60 = vmul.f32 %v707_v13, %v692_v51 }
 0xb29   :  { %797 = vrot.lane.b32.xlu1 %v709_v60, %s1612_s12 }
 0xb3a   :  { %v792_v14 = vpop.permute.xlu0 %791 }
 0xb3b   :  { %v794_v15 = vmul.f32 %v792_v14, %v777_v1 }
 0xb3d   :  { %882 = vrot.lane.b32.xlu2 %v794_v15, %s1612_s12 }
 0xb97   :  { %v883_v16 = vpop.permute.xlu2 %882 }
 0xb98   :  { %1421 = vmatmul.msk.f32.vlgmr.msra.gmra.mxu2 %vm215_vm9, %v883_v16 }
 0xb99   :  { %1200 = vmatpush.msra.mxu2 %v1786_v40 }
 0xb9b   :  { %v798_v17 = vpop.permute.xlu1 %797  ;;  %1201 = vmatpush.msra.mxu2 %v1789_v41 }
 0xb9c   :  { %1417 = vmatmul.msk.f32.vlgmr.msrb.gmra.mxu3 %vm215_vm9, %v798_v17  ;;  %1420 = vmatmul.msk.f32.vlgmr.msra.gmra.mxu1 %vm215_vm9, %v798_v17 }
 0xb9d   :  { %1115 = vmatpush.msrb.mxu3 %v1707_v31  ;;  %1175 = vmatpush.msra.mxu1 %v1709_v32  ;;  %v142_v31 = vpop.f32.mrf.mxu0 }
 0xb9e   :  { %1202 = vmatpush.msra.mxu2 %v1791_v42 }
 0xb9f   :  { %1116 = vmatpush.msrb.mxu3 %v1714_v33  ;;  %1176 = vmatpush.msra.mxu1 %v1718_v34  ;;  %v143_v33 = vadd.f32 %v1692_v6, %v142_v31  ;;  %v1549_v31 = vld [vmem:[#allocation3 + $0x18] sm:$0xff] }
 0xba0   :  { %1203 = vmatpush.msra.mxu2 %v1794_v43 }
 0xba1   :  { %1117 = vmatpush.msrb.mxu3 %v1723_v35  ;;  %1177 = vmatpush.msra.mxu1 %v1725_v36 }
 0xba3   :  { %1118 = vmatpush.msrb.mxu3 %v1737_v38  ;;  %1178 = vmatpush.msra.mxu1 %v1739_v39 }
 0xc19   :  { %v878_v18 = vpop.f32.mrf.mxu1 }
 0xc1a   :  { %v879_v32 = vadd.f32 %v1767_v48, %v878_v18 }
 0xc1b   :  { %v903_v19 = vpop.f32.mrf.mxu2 }
 0xc1c   :  { %v906_v20 = vadd.f32 %v903_v19, %v879_v32  ;;  %v1550_v32 = vld [vmem:[#allocation3 + $0x10] sm:$0xff]  ;;  %v1551_v19 = vld [vmem:[#allocation3 + $0x8] sm:$0xff] }
 0xc1e   :  { %v1422_v21 = vmul.f32 -1.442695, %v906_v20  ;;  %v1552_v20 = vld [vmem:[#allocation3] sm:$0xff] }
 0xc1f   :  { %v818_v34 = vpop.f32.mrf.mxu3 }
 0xc20   :  { %1507 = vpow2.f32 %v1422_v21  ;;  %v821_v23 = vadd.f32 %v818_v34, %v143_v33 }
 0xc22   :  { %v1418_v24 = vmul.f32 -1.442695, %v821_v23 }
 0xc24   :  { %1509 = vpow2.f32 %v1418_v24 }
 0xc26   :  { %v1508_v35 = vpop.eup %1507 }
 0xc27   :  { %v910_v36 = vadd.f32 1.0, %v1508_v35 }
 0xc29   :  { %1511 = vrcp.f32 %v910_v36  ;;  %v920_v37 = vand.u32 2147483647, %v910_v36  ;;  %v922_v44 = vand.u32 2147483648, %v910_v36  ;;  %vm916_vm2 = vweird.f32 %v910_v36 }
 0xc2a   :  { %v1510_v38 = vpop.eup %1509 }
 0xc2b   :  { %v825_v26 = vadd.f32 1.0, %v1510_v38  ;;  %vm921_vm4 = vcmp.eq.f32.partialorder %v920_v37, 8.507059e+37  ;;  %v923_v50 = vor.u32 1.1754944e-38, %v922_v44 }
 0xc2d   :  { %1513 = vrcp.f32 %v825_v26  ;;  %v837_v51 = vand.u32 2147483648, %v825_v26  ;;  %v835_v54 = vand.u32 2147483647, %v825_v26  ;;  %vm831_vm6 = vweird.f32 %v825_v26 }
 0xc2f   :  { %v1512_v39 = vpop.eup %1511  ;;  %v838_v57 = vor.u32 1.1754944e-38, %v837_v51  ;;  %vm836_vm10 = vcmp.eq.f32.partialorder %v835_v54, 8.507059e+37 }
 0xc30   :  { %v912_v27 = vmul.f32 %v1512_v39, %v910_v36  ;;  %vm917_vm0 = vweird.f32 %v1512_v39 }
 0xc31   :  { %vm918_vm3 = vmor %vm916_vm2, %vm917_vm0 }
 0xc32   :  { %v913_v29 = vsub.f32 1.0, %v912_v27 }
 0xc33   :  { %v1514_v30 = vpop.eup %1513 }
 0xc34   :  { %v827_v45 = vmul.f32 %v1514_v30, %v825_v26  ;;  %v914_v6 = vmul.f32 %v1512_v39, %v913_v29  ;;  %vm832_vm5 = vweird.f32 %v1514_v30 }
 0xc35   :  { %vm833_vm7 = vmor %vm831_vm6, %vm832_vm5 }
 0xc36   :  { %v828_v46 = vsub.f32 1.0, %v827_v45  ;;  %v915_v47 = vadd.f32 %v1512_v39, %v914_v6 }
 0xc38   :  { %v919_v22 = vsel %vm918_vm3, %v1512_v39, %v915_v47  ;;  %v829_v52 = vmul.f32 %v1514_v30, %v828_v46 }
 0xc39   :  { %v924_v55 = vsel %vm921_vm4, %v923_v50, %v919_v22 }
 0xc3a   :  { %v926_v28 = vmul.f32 2.0, %v924_v55  ;;  %v830_v56 = vadd.f32 %v1514_v30, %v829_v52 }
 0xc3c   :  { %v1423_v58 = vadd.f32 -1.0, %v926_v28  ;;  %v834_v59 = vsel %vm833_vm7, %v1514_v30, %v830_v56 }
 0xc3d   :  { %v839_v61 = vsel %vm836_vm10, %v838_v57, %v834_v59 }
 0xc3e   :  { %v928_v62 = vsel %vm1695_vm8, %v1423_v58, %v924_v55  ;;  %v841_v0 = vmul.f32 2.0, %v839_v61 }
 0xc3f   :  { %931 = vrot.lane.b32.xlu1 %v928_v62, %s1611_s1  ;;  %v929_v12 = vmul.f32 %v928_v62, %v1916_v7  ;;  %v70_v7 = vld [vmem:[%s2062_s0 + $0x30] sm:$0xff] }
 0xc40   :  { %v1419_v1 = vadd.f32 -1.0, %v841_v0  ;;  %1386 = vmatmul.msk.f32.gmra.mxu0 %vm81_vm1, %v70_v7 }
 0xc42   :  { %v843_v2 = vsel %vm1695_vm8, %v1419_v1, %v839_v61 }
 0xc43   :  { %846 = vrot.lane.b32.xlu0 %v843_v2, %s1611_s1  ;;  %v844_v5 = vmul.f32 %v843_v2, %v1920_v10 }
 0xcb1   :  { %v932_v53 = vpop.permute.xlu1 %931 }
 0xcb2   :  { %v934_v3 = vmul.f32 %v932_v53, %v928_v62 }
 0xcb4   :  { %936 = vrot.lane.b32.xlu0 %v934_v3, %s1612_s12 }
 0xcb5   :  { %v847_v4 = vpop.permute.xlu0 %846 }
 0xcb6   :  { %v849_v49 = vmul.f32 %v847_v4, %v843_v2 }
 0xcb8   :  { %851 = vrot.lane.b32.xlu2 %v849_v49, %s1612_s12 }
 0xcbd   :  { %v145_v21 = vpop.f32.mrf.mxu0 }
 0xd12   :  { %v852_v8 = vpop.permute.xlu2 %851 }
 0xd13   :  { %v1957_v9 = vadd.f32 %v852_v8, %v844_v5 }
 0xd15   :  { %1515 = vtanh.f32 %v1957_v9 }
 0xd1b   :  { %v1516_v11 = vpop.eup %1515 }
 0xd1c   :  { %857 = vrot.lane.b32.xlu1 %v1516_v11, %s1611_s1 }
 0xd26   :  { %v937_v13 = vpop.permute.xlu0 %936 }
 0xd27   :  { %v1962_v60 = vadd.f32 %v937_v13, %v929_v12 }
 0xd29   :  { %1517 = vtanh.f32 %v1962_v60 }
 0xd2f   :  { %v1518_v14 = vpop.eup %1517 }
 0xd30   :  { %942 = vrot.lane.b32.xlu2 %v1518_v14, %s1611_s1 }
 0xd8a   :  { %v943_v15 = vpop.permute.xlu2 %942 }
 0xd8b   :  { %v945_v10 = vmul.f32 %v943_v15, %v928_v62 }
 0xd8d   :  { %1033 = vrot.lane.b32.xlu1 %v945_v10, %s1612_s12 }
 0xd8e   :  { %v858_v63 = vpop.permute.xlu1 %857 }
 0xd8f   :  { %v860_v16 = vmul.f32 %v858_v63, %v843_v2 }
 0xd91   :  { %948 = vrot.lane.b32.xlu0 %v860_v16, %s1612_s12 }
 0xdff   :  { %v1034_v17 = vpop.permute.xlu1 %1033 }
 0xe00   :  { %1428 = vmatmul.msk.f32.vlgmr.msrb.gmra.mxu2 %vm215_vm9, %v1034_v17 }
 0xe03   :  { %v949_v18 = vpop.permute.xlu0 %948 }
 0xe04   :  { %1424 = vmatmul.msk.f32.vlgmr.msra.gmra.mxu3 %vm215_vm9, %v949_v18  ;;  %1427 = vmatmul.msk.f32.vlgmr.msrb.gmra.mxu1 %vm215_vm9, %v949_v18 }
 0xe05   :  { %1290 = vmatpush.msrb.mxu1 %v1786_v40  ;;  %1265 = vmatpush.msra.mxu3 %v1549_v31 }
 0xe07   :  { %1291 = vmatpush.msrb.mxu1 %v1789_v41  ;;  %1266 = vmatpush.msra.mxu3 %v1550_v32  ;;  %v1983_v41 = vld [vmem:[%s2065_s3] ss:$0 sm:$0xff] }
 0xe08   :  { %v146_v24 = vadd.f32 %v1983_v41, %v145_v21 }
 0xe09   :  { %1292 = vmatpush.msrb.mxu1 %v1791_v42  ;;  %1267 = vmatpush.msra.mxu3 %v1551_v19 }
 0xe0b   :  { %1293 = vmatpush.msrb.mxu1 %v1794_v43  ;;  %1268 = vmatpush.msra.mxu3 %v1552_v20 }
 0xe81   :  { %v1029_v33 = vpop.f32.mrf.mxu1 }
 0xe82   :  { %v1030_v34 = vadd.f32 %v1767_v48, %v1029_v33 }
 0xe83   :  { %v1054_v23 = vpop.f32.mrf.mxu2 }
 0xe84   :  { %v1057_v40 = vadd.f32 %v1054_v23, %v1030_v34 }
 0xe86   :  { %v1429_v42 = vmul.f32 -1.442695, %v1057_v40 }
 0xe87   :  { %v969_v35 = vpop.f32.mrf.mxu3 }
 0xe88   :  { %1519 = vpow2.f32 %v1429_v42  ;;  %v972_v36 = vadd.f32 %v969_v35, %v146_v24  ;;  %v2017_v24 = vld [vmem:[%s2068_s6] ss:$0 sm:$0xff] }
 0xe8a   :  { %v1425_v43 = vmul.f32 -1.442695, %v972_v36 }
 0xe8c   :  { %1521 = vpow2.f32 %v1425_v43 }
 0xe8e   :  { %v1520_v38 = vpop.eup %1519 }
 0xe8f   :  { %v1061_v26 = vadd.f32 1.0, %v1520_v38 }
 0xe91   :  { %1523 = vrcp.f32 %v1061_v26  ;;  %v1071_v44 = vand.u32 2147483647, %v1061_v26  ;;  %v1073_v45 = vand.u32 2147483648, %v1061_v26  ;;  %vm1067_vm12 = vweird.f32 %v1061_v26 }
 0xe92   :  { %v1522_v39 = vpop.eup %1521 }
 0xe93   :  { %v976_v48 = vadd.f32 1.0, %v1522_v39  ;;  %vm1072_vm14 = vcmp.eq.f32.partialorder %v1071_v44, 8.507059e+37  ;;  %v1074_v51 = vor.u32 1.1754944e-38, %v1073_v45 }
 0xe95   :  { %1525 = vrcp.f32 %v976_v48  ;;  %v988_v22 = vand.u32 2147483648, %v976_v48  ;;  %v986_v55 = vand.u32 2147483647, %v976_v48  ;;  %vm982_vm0 = vweird.f32 %v976_v48 }
 0xe97   :  { %v1524_v27 = vpop.eup %1523  ;;  %v989_v58 = vor.u32 1.1754944e-38, %v988_v22  ;;  %vm987_vm3 = vcmp.eq.f32.partialorder %v986_v55, 8.507059e+37 }
 0xe98   :  { %v1063_v29 = vmul.f32 %v1524_v27, %v1061_v26  ;;  %vm1068_vm11 = vweird.f32 %v1524_v27 }
 0xe99   :  { %vm1069_vm13 = vmor %vm1067_vm12, %vm1068_vm11 }
 0xe9a   :  { %v1064_v30 = vsub.f32 1.0, %v1063_v29 }
 0xe9b   :  { %v1526_v37 = vpop.eup %1525 }
 0xe9c   :  { %v978_v6 = vmul.f32 %v1526_v37, %v976_v48  ;;  %v1065_v46 = vmul.f32 %v1524_v27, %v1064_v30  ;;  %vm983_vm15 = vweird.f32 %v1526_v37 }
 0xe9d   :  { %vm984_vm2 = vmor %vm982_vm0, %vm983_vm15 }
 0xe9e   :  { %v979_v47 = vsub.f32 1.0, %v978_v6  ;;  %v1066_v50 = vadd.f32 %v1524_v27, %v1065_v46 }
 0xea0   :  { %v1070_v52 = vsel %vm1069_vm13, %v1524_v27, %v1066_v50  ;;  %v980_v54 = vmul.f32 %v1526_v37, %v979_v47 }
 0xea1   :  { %v1075_v28 = vsel %vm1072_vm14, %v1074_v51, %v1070_v52 }
 0xea2   :  { %v1077_v56 = vmul.f32 2.0, %v1075_v28  ;;  %v981_v57 = vadd.f32 %v1526_v37, %v980_v54 }
 0xea4   :  { %v1430_v59 = vadd.f32 -1.0, %v1077_v56  ;;  %v985_v61 = vsel %vm984_vm2, %v1526_v37, %v981_v57 }
 0xea5   :  { %v990_v62 = vsel %vm987_vm3, %v989_v58, %v985_v61 }
 0xea6   :  { %v1079_v0 = vsel %vm1695_vm8, %v1430_v59, %v1075_v28  ;;  %v992_v1 = vmul.f32 2.0, %v990_v62 }
 0xea7   :  { %1082 = vrot.lane.b32.xlu0 %v1079_v0, %s1611_s1  ;;  %v1080_v8 = vmul.f32 %v1079_v0, %v1962_v60 }
 0xea8   :  { %v1426_v2 = vadd.f32 -1.0, %v992_v1 }
 0xeaa   :  { %v994_v53 = vsel %vm1695_vm8, %v1426_v2, %v990_v62 }
 0xeab   :  { %997 = vrot.lane.b32.xlu2 %v994_v53, %s1611_s1  ;;  %v995_v13 = vmul.f32 %v994_v53, %v1957_v9  ;;  %v71_v9 = vld [vmem:[%s2062_s0 + $0x38] sm:$0xff] }
 0xeac   :  { %1387 = vmatmul.msk.f32.gmra.mxu0 %vm81_vm1, %v71_v9 }
 0xf05   :  { %v998_v3 = vpop.permute.xlu2 %997 }
 0xf06   :  { %v1000_v4 = vmul.f32 %v998_v3, %v994_v53 }
 0xf08   :  { %1002 = vrot.lane.b32.xlu1 %v1000_v4, %s1612_s12 }
 0xf19   :  { %v1083_v49 = vpop.permute.xlu0 %1082 }
 0xf1a   :  { %v1085_v5 = vmul.f32 %v1083_v49, %v1079_v0 }
 0xf1c   :  { %1087 = vrot.lane.b32.xlu2 %v1085_v5, %s1612_s12 }
 0xf29   :  { %v148_v32 = vpop.f32.mrf.mxu0 }
 0xf2a   :  { %v149_v19 = vadd.f32 %v1983_v41, %v148_v32 }
 0xf76   :  { %v1088_v11 = vpop.permute.xlu2 %1087 }
 0xf77   :  { %v1995_v12 = vadd.f32 %v1088_v11, %v1080_v8 }
 0xf79   :  { %1527 = vtanh.f32 %v1995_v12 }
 0xf7a   :  { %v1003_v14 = vpop.permute.xlu1 %1002 }
 0xf7b   :  { %v1999_v15 = vadd.f32 %v1003_v14, %v995_v13 }
 0xf7d   :  { %1529 = vtanh.f32 %v1999_v15 }
 0xf7f   :  { %v1528_v10 = vpop.eup %1527 }
 0xf80   :  { %1093 = vrot.lane.b32.xlu1 %v1528_v10, %s1611_s1 }
 0xf83   :  { %v1530_v63 = vpop.eup %1529 }
 0xf84   :  { %1008 = vrot.lane.b32.xlu0 %v1530_v63, %s1611_s1 }
 0xff2   :  { %v1094_v16 = vpop.permute.xlu1 %1093 }
 0xff3   :  { %v1096_v60 = vmul.f32 %v1094_v16, %v1079_v0 }
 0xff5   :  { %1184 = vrot.lane.b32.xlu0 %v1096_v60, %s1612_s12 }
 0xff6   :  { %v1009_v7 = vpop.permute.xlu0 %1008 }
 0xff7   :  { %v1011_v17 = vmul.f32 %v1009_v7, %v994_v53 }
 0xff9   :  { %1099 = vrot.lane.b32.xlu2 %v1011_v17, %s1612_s12 }
0x1053   :  { %v1100_v18 = vpop.permute.xlu2 %1099 }
0x1054   :  { %1431 = vmatmul.msk.f32.vlgmr.msrb.gmra.mxu3 %vm215_vm9, %v1100_v18  ;;  %1434 = vmatmul.msk.f32.vlgmr.msra.gmra.mxu1 %vm215_vm9, %v1100_v18 }
0x1067   :  { %v1185_v31 = vpop.permute.xlu0 %1184 }
0x1068   :  { %1435 = vmatmul.msk.f32.vlgmr.msra.gmra.mxu2 %vm215_vm9, %v1185_v31 }
0x10d1   :  { %v1180_v40 = vpop.f32.mrf.mxu1 }
0x10d2   :  { %v1181_v42 = vadd.f32 %v2017_v24, %v1180_v40 }
0x10d7   :  { %v1120_v20 = vpop.f32.mrf.mxu3 }
0x10d8   :  { %v1123_v33 = vadd.f32 %v1120_v20, %v149_v19 }
0x10da   :  { %v1432_v21 = vmul.f32 -1.442695, %v1123_v33 }
0x10dc   :  { %1531 = vpow2.f32 %v1432_v21 }
0x10e2   :  { %v1532_v34 = vpop.eup %1531 }
0x10e3   :  { %v1127_v23 = vadd.f32 1.0, %v1532_v34 }
0x10e5   :  { %1533 = vrcp.f32 %v1127_v23  ;;  %v1139_v39 = vand.u32 2147483648, %v1127_v23  ;;  %v1137_v27 = vand.u32 2147483647, %v1127_v23  ;;  %vm1133_vm4 = vweird.f32 %v1127_v23 }
0x10e7   :  { %v1140_v30 = vor.u32 1.1754944e-38, %v1139_v39  ;;  %vm1138_vm6 = vcmp.eq.f32.partialorder %v1137_v27, 8.507059e+37 }
0x10eb   :  { %v1534_v35 = vpop.eup %1533  ;;  %v1205_v36 = vpop.f32.mrf.mxu2 }
0x10ec   :  { %v1129_v43 = vmul.f32 %v1534_v35, %v1127_v23  ;;  %v1208_v38 = vadd.f32 %v1205_v36, %v1181_v42  ;;  %vm1134_vm1 = vweird.f32 %v1534_v35 }
0x10ed   :  { %vm1135_vm5 = vmor %vm1133_vm4, %vm1134_vm1 }
0x10ee   :  { %v1130_v41 = vsub.f32 1.0, %v1129_v43  ;;  %v1436_v26 = vmul.f32 -1.442695, %v1208_v38 }
0x10f0   :  { %1535 = vpow2.f32 %v1436_v26  ;;  %v1131_v48 = vmul.f32 %v1534_v35, %v1130_v41 }
0x10f2   :  { %v1132_v29 = vadd.f32 %v1534_v35, %v1131_v48 }
0x10f4   :  { %v1136_v37 = vsel %vm1135_vm5, %v1534_v35, %v1132_v29 }
0x10f5   :  { %v1141_v44 = vsel %vm1138_vm6, %v1140_v30, %v1136_v37 }
0x10f6   :  { %v1536_v45 = vpop.eup %1535  ;;  %v1143_v6 = vmul.f32 2.0, %v1141_v44 }
0x10f7   :  { %v1212_v46 = vadd.f32 1.0, %v1536_v45  ;;  %v1339_v45 = vld [vmem:[%s2069_s7 + $0x8] sm:$0xff] }
0x10f8   :  { %v1433_v47 = vadd.f32 -1.0, %v1143_v6  ;;  %v1338_v6 = vld [vmem:[%s2069_s7] sm:$0xff] }
0x10f9   :  { %1537 = vrcp.f32 %v1212_v46  ;;  %v1224_v54 = vand.u32 2147483648, %v1212_v46  ;;  %v1222_v28 = vand.u32 2147483647, %v1212_v46  ;;  %vm1218_vm10 = vweird.f32 %v1212_v46 }
0x10fa   :  { %v1145_v50 = vsel %vm1695_vm8, %v1433_v47, %v1141_v44  ;;  %v1341_v44 = vld [vmem:[%s2069_s7 + $0x18] sm:$0xff] }
0x10fb   :  { %1148 = vrot.lane.b32.xlu1 %v1145_v50, %s1611_s1  ;;  %v1225_v57 = vor.u32 1.1754944e-38, %v1224_v54  ;;  %vm1223_vm12 = vcmp.eq.f32.partialorder %v1222_v28, 8.507059e+37  ;;  %v1146_v8 = vmul.f32 %v1145_v50, %v1999_v15  ;;  %1363 = vmatpush.msrb.mxu2 %v1341_v44 }
0x10fd   :  { %1364 = vmatpush.msrb.mxu2 %v1340_v25 }
0x10ff   :  { %v1538_v51 = vpop.eup %1537  ;;  %1365 = vmatpush.msrb.mxu2 %v1339_v45 }
0x1100   :  { %v1214_v22 = vmul.f32 %v1538_v51, %v1212_v46  ;;  %vm1219_vm7 = vweird.f32 %v1538_v51 }
0x1101   :  { %vm1220_vm11 = vmor %vm1218_vm10, %vm1219_vm7  ;;  %1366 = vmatpush.msrb.mxu2 %v1338_v6 }
0x1102   :  { %v1215_v52 = vsub.f32 1.0, %v1214_v22 }
0x1104   :  { %v1216_v55 = vmul.f32 %v1538_v51, %v1215_v52 }
0x1106   :  { %v1217_v56 = vadd.f32 %v1538_v51, %v1216_v55 }
0x1108   :  { %v1221_v58 = vsel %vm1220_vm11, %v1538_v51, %v1217_v56  ;;  %v1452_v51 = vld [vmem:[%s2070_s8] ss:$0 sm:$0xff] }
0x1109   :  { %v1226_v59 = vsel %vm1223_vm12, %v1225_v57, %v1221_v58 }
0x110a   :  { %v1228_v61 = vmul.f32 2.0, %v1226_v59 }
0x110c   :  { %v1437_v62 = vadd.f32 -1.0, %v1228_v61 }
0x110e   :  { %v1230_v0 = vsel %vm1695_vm8, %v1437_v62, %v1226_v59 }
0x110f   :  { %1233 = vrot.lane.b32.xlu2 %v1230_v0, %s1611_s1  ;;  %v1231_v4 = vmul.f32 %v1230_v0, %v1995_v12 }
0x1169   :  { %v1234_v1 = vpop.permute.xlu2 %1233 }
0x116a   :  { %v1236_v2 = vmul.f32 %v1234_v1, %v1230_v0 }
0x116c   :  { %1238 = vrot.lane.b32.xlu1 %v1236_v2, %s1612_s12 }
0x116d   :  { %v1149_v53 = vpop.permute.xlu1 %1148 }
0x116e   :  { %v1151_v3 = vmul.f32 %v1149_v53, %v1145_v50 }
0x1170   :  { %1153 = vrot.lane.b32.xlu0 %v1151_v3, %s1612_s12 }
0x11de   :  { %v1239_v49 = vpop.permute.xlu1 %1238 }
0x11df   :  { %v1241_v5 = vadd.f32 %v1239_v49, %v1231_v4 }
0x11e1   :  { %1539 = vtanh.f32 %v1241_v5 }
0x11e2   :  { %v1154_v11 = vpop.permute.xlu0 %1153 }
0x11e3   :  { %v1156_v13 = vadd.f32 %v1154_v11, %v1146_v8 }
0x11e5   :  { %1541 = vtanh.f32 %v1156_v13 }
0x11e7   :  { %v1540_v14 = vpop.eup %1539 }
0x11e8   :  { %1244 = vrot.lane.b32.xlu0 %v1540_v14, %s1611_s1 }
0x11eb   :  { %v1542_v10 = vpop.eup %1541 }
0x11ec   :  { %1159 = vrot.lane.b32.xlu2 %v1542_v10, %s1611_s1 }
0x1246   :  { %v1160_v63 = vpop.permute.xlu2 %1159 }
0x1247   :  { %v1162_v16 = vmul.f32 %v1160_v63, %v1145_v50 }
0x1249   :  { %1249 = vrot.lane.b32.xlu1 %v1162_v16, %s1612_s12 }
0x125a   :  { %v1245_v60 = vpop.permute.xlu0 %1244 }
0x125b   :  { %v1247_v12 = vmul.f32 %v1245_v60, %v1230_v0 }
0x125d   :  { %1274 = vrot.lane.b32.xlu2 %v1247_v12, %s1612_s12 }
0x12b7   :  { %v1275_v7 = vpop.permute.xlu2 %1274 }
0x12b8   :  { %1439 = vmatmul.msk.f32.vlgmr.msrb.gmra.mxu1 %vm215_vm9, %v1275_v7 }
0x12bb   :  { %v1250_v15 = vpop.permute.xlu1 %1249 }
0x12bc   :  { %1438 = vmatmul.msk.f32.vlgmr.msra.gmra.mxu3 %vm215_vm9, %v1250_v15 }
0x1335   :  { %v1295_v18 = vpop.f32.mrf.mxu1 }
0x133f   :  { %v1270_v17 = vpop.f32.mrf.mxu3 }
0x1340   :  { %v1271_v9 = vadd.f32 %v2017_v24, %v1270_v17 }
0x1342   :  { %v1298_v31 = vadd.f32 %v1295_v18, %v1271_v9 }
0x1344   :  { %v1440_v32 = vmul.f32 -1.442695, %v1298_v31 }
0x1346   :  { %1543 = vpow2.f32 %v1440_v32 }
0x134c   :  { %v1544_v19 = vpop.eup %1543 }
0x134d   :  { %v1302_v20 = vadd.f32 1.0, %v1544_v19 }
0x134f   :  { %1545 = vrcp.f32 %v1302_v20  ;;  %v1314_v23 = vand.u32 2147483648, %v1302_v20  ;;  %v1312_v42 = vand.u32 2147483647, %v1302_v20  ;;  %vm1308_vm14 = vweird.f32 %v1302_v20 }
0x1351   :  { %v1315_v36 = vor.u32 1.1754944e-38, %v1314_v23  ;;  %vm1313_vm0 = vcmp.eq.f32.partialorder %v1312_v42, 8.507059e+37 }
0x1355   :  { %v1546_v33 = vpop.eup %1545 }
0x1356   :  { %v1304_v21 = vmul.f32 %v1546_v33, %v1302_v20  ;;  %vm1309_vm13 = vweird.f32 %v1546_v33 }
0x1357   :  { %vm1310_vm15 = vmor %vm1308_vm14, %vm1309_vm13 }
0x1358   :  { %v1305_v34 = vsub.f32 1.0, %v1304_v21 }
0x135a   :  { %v1306_v40 = vmul.f32 %v1546_v33, %v1305_v34 }
0x135c   :  { %v1307_v35 = vadd.f32 %v1546_v33, %v1306_v40 }
0x135e   :  { %v1311_v43 = vsel %vm1310_vm15, %v1546_v33, %v1307_v35 }
0x135f   :  { %v1316_v24 = vsel %vm1313_vm0, %v1315_v36, %v1311_v43 }
0x1360   :  { %v1318_v38 = vmul.f32 2.0, %v1316_v24 }
0x1362   :  { %v1441_v41 = vadd.f32 -1.0, %v1318_v38 }
0x1364   :  { %v1320_v26 = vsel %vm1695_vm8, %v1441_v41, %v1316_v24  ;;  %vm1371_vm8 = vcmask 15360  }
0x1365   :  { %1323 = vrot.lane.b32.xlu0 %v1320_v26, %s1611_s1  ;;  %v1321_v27 = vmul.f32 %v1320_v26, %v1241_v5 }
0x13d7   :  { %v1324_v39 = vpop.permute.xlu0 %1323 }
0x13d8   :  { %v1326_v48 = vmul.f32 %v1324_v39, %v1320_v26 }
0x13da   :  { %1328 = vrot.lane.b32.xlu1 %v1326_v48, %s1612_s12 }
0x144c   :  { %v1329_v29 = vpop.permute.xlu1 %1328 }
0x144d   :  { %v1331_v30 = vadd.f32 %v1329_v29, %v1321_v27 }
0x144f   :  { %1547 = vtanh.f32 %v1331_v30 }
0x1455   :  { %v1548_v37 = vpop.eup %1547 }
0x1456   :  { %1334 = vrot.lane.b32.xlu2 %v1548_v37, %s1611_s1 }
0x14b0   :  { %v1335_v46 = vpop.permute.xlu2 %1334 }
0x14b1   :  { %v1337_v47 = vmul.f32 %v1335_v46, %v1320_v26 }
0x14b3   :  { %1347 = vrot.lane.b32.xlu0 %v1337_v47, %s1612_s12 }
0x1525   :  { %v1348_v50 = vpop.permute.xlu0 %1347 }
0x1526   :  { %1442 = vmatmul.msk.f32.vlgmr.msrb.gmra.mxu2 %vm215_vm9, %v1348_v50 }
0x15a9   :  { %v1368_v22 = vpop.f32.mrf.mxu2 }
0x15aa   :  { %v1369_v52 = vadd.f32 %v1452_v51, %v1368_v22 }
0x15ac   :  { %1372 = vst.msk [vmem:[%s2071_s9] sm:$0xff] %vm1371_vm8, %v1369_v52 }
0x15ad   :  { %1377 = vsyncpa [#allocation4], 1 }
0x15ae   :  { %1378 = vsyncpa [#allocation6], 1 }

</bundles_post_ra>
